<compile_context>
chip_gen: v7x
topology: tpu7x:2x2x1
jax: 0.10.0
libtpu: 0.0.40
codegen_flags: <defaults>
</compile_context>

<pallas_src>
import functools

import jax
import jax.numpy as jnp
import numpy as np
from jax.experimental import pallas as pl
from jax.experimental.pallas import tpu as pltpu


def _prelu(v, a):
    return jnp.where(v >= 0, v, a * v)


def gamlp_kernel(feats_ref, aggm_ref, jkw1_ref, jkw2_ref, attjk_ref, attx_ref,
                 outw1_ref, outw2_ref, scal_ref, out_ref, *, num_hops):
    # scalars (SMEM): [model_prelu_alpha, jkffn_prelu_alpha, outffn_prelu_alpha, att_bias]
    a_model = scal_ref[0]
    a_jk = scal_ref[1]
    a_out = scal_ref[2]
    att_b = scal_ref[3]

    w_jk_col = attjk_ref[...]                                 # (hidden, 1)
    w_x_col = attx_ref[...]                                   # (D, 1)

    # ---- per-hop: weighted aggregation as a matmul, JK layer-1 accumulation,
    # ---- and the per-hop attention-score contribution -----------------------
    x_list = []
    s_x_list = []
    h1 = None
    for h in range(num_hops):
        # (TN, F*D) bf16 @ (F*D, D) bf16 -> (TN, D) f32   (WeightedAggregator)
        x_h = jnp.dot(feats_ref[h], aggm_ref[h],
                      preferred_element_type=jnp.float32)
        x_list.append(x_h)
        # x_cat @ W_jk1 == sum_h x_h @ W_jk1[h]
        contrib = jnp.dot(x_h, jkw1_ref[h], preferred_element_type=jnp.float32)
        h1 = contrib if h1 is None else h1 + contrib
        # per-hop attention-score term  x_h @ w_x  (MXU, not cross-lane sum)
        s_x_list.append(jnp.dot(x_h, w_x_col,
                                preferred_element_type=jnp.float32))   # (TN, 1)

    # ---- lr_jk_ref (FeedForwardNetII, 2 layers) + model PReLU ----------------
    h1 = _prelu(h1, a_jk)
    jk = _prelu(jnp.dot(h1, jkw2_ref[...], preferred_element_type=jnp.float32),
                a_model)                                      # (TN, hidden)

    # ---- attention scores: relu(Linear(cat(jk, x_i))) per hop ----------------
    s_jk = jnp.dot(jk, w_jk_col, preferred_element_type=jnp.float32)   # (TN, 1)
    s_list = [jnp.maximum(s_jk + s_x + att_b, 0.0) for s_x in s_x_list]

    # ---- softmax over hops (unrolled over the small hop count) --------------
    m = s_list[0]
    for s in s_list[1:]:
        m = jnp.maximum(m, s)
    e_list = [jnp.exp(s - m) for s in s_list]
    denom = e_list[0]
    for e in e_list[1:]:
        denom = denom + e
    inv = pl.reciprocal(denom, approx=True)                   # (TN, 1)

    # ---- attention-weighted hop sum ------------------------------------------
    right = x_list[0] * (e_list[0] * inv)
    for h in range(1, num_hops):
        right = right + x_list[h] * (e_list[h] * inv)         # (TN, D)

    # ---- lr_output (FeedForwardNetII, 2 layers), lane-dense padded output ----
    o = _prelu(jnp.dot(right, outw1_ref[...], preferred_element_type=jnp.float32),
               a_out)
    o = jnp.dot(o, outw2_ref[...], preferred_element_type=jnp.float32)
    out_ref[...] = o.astype(out_ref.dtype)


def _pick_tile_n(n, desired):
    """Largest node tile <= desired that divides n, is a multiple of 8, and
    keeps the grid >= 2 steps when possible (v7x megacore)."""
    desired = max(8, min(desired, n))
    if n >= 16 and desired > n // 2:
        desired = max(8, n // 2)
    t = (desired // 8) * 8
    while t > 8 and n % t != 0:
        t -= 8
    if t < 8 or n % t != 0:
        t = n
    return t


def nars_jk_gamlp_forward(feats, label_emb, params, *, tile_n=None):
    """feats: (num_hops, N, num_feats, nfeat) float32.

    label_emb is accepted for API parity but unused (see TODO at top)."""
    del label_emb
    num_hops, n_nodes, num_feats, nfeat = feats.shape
    hidden = params["jk_w2"].shape[0]
    nclass = params["out_w2"].shape[1]
    fd = num_feats * nfeat
    nc_pad = ((nclass + 127) // 128) * 128

    # Lane-dense feats, bf16 to halve the dominant HBM stream.
    feats_ld = feats.reshape(num_hops, n_nodes, fd).astype(jnp.bfloat16)

    # Fold the weighted aggregation into per-hop (F*D, D) matmul weights:
    #   agg_mat[h, f*D + d, d'] = agg_w[h, f, d] * delta(d, d')
    eye = jnp.eye(nfeat, dtype=jnp.float32)
    agg_mat = (params["agg_w"][:, :, :, None] * eye[None, None]).reshape(
        num_hops, fd, nfeat).astype(jnp.bfloat16)

    # Per-hop JK layer-1 weights (avoids transpose+reshape inside the kernel).
    jk_w1 = params["jk_w1"].reshape(num_hops, nfeat, hidden)

    # Split attention weights into the jk part and the per-hop-x part.
    att_flat = params["att_w"].reshape(hidden + nfeat)
    att_wjk = att_flat[:hidden].reshape(hidden, 1)
    att_wx = att_flat[hidden:].reshape(nfeat, 1)

    # Lane-dense (zero-padded) output weights.
    out_w2p = jnp.zeros((hidden, nc_pad), jnp.float32)
    out_w2p = out_w2p.at[:, :nclass].set(params["out_w2"])

    tile_n = _pick_tile_n(n_nodes, 512 if tile_n is None else tile_n)
    assert n_nodes % tile_n == 0
    grid = (n_nodes // tile_n,)

    # Explicit VMEM budget: double-buffered feats/out tiles + resident weights.
    est_bytes = (
        2 * num_hops * tile_n * fd * 2          # feats tile, bf16, 2 buffers
        + 2 * tile_n * nc_pad * 4               # out tile, f32, 2 buffers
        + num_hops * fd * nfeat * 2             # agg_mat (bf16)
        + (num_hops * nfeat * hidden + hidden * hidden
           + nfeat * hidden + hidden * nc_pad + hidden + nfeat) * 4)
    vmem_limit = int(min(max(4 * est_bytes, 32 * 2**20), 48 * 2**20))

    kernel = functools.partial(gamlp_kernel, num_hops=num_hops)

    out = pl.pallas_call(
        kernel,
        out_shape=jax.ShapeDtypeStruct((n_nodes, nc_pad), jnp.float32),
        grid=grid,
        in_specs=[
            pl.BlockSpec((num_hops, tile_n, fd), lambda i: (0, i, 0)),
            pl.BlockSpec((num_hops, fd, nfeat), lambda i: (0, 0, 0)),
            pl.BlockSpec((num_hops, nfeat, hidden), lambda i: (0, 0, 0)),
            pl.BlockSpec((hidden, hidden), lambda i: (0, 0)),
            pl.BlockSpec((hidden, 1), lambda i: (0, 0)),
            pl.BlockSpec((nfeat, 1), lambda i: (0, 0)),
            pl.BlockSpec((nfeat, hidden), lambda i: (0, 0)),
            pl.BlockSpec((hidden, nc_pad), lambda i: (0, 0)),
            pl.BlockSpec(memory_space=pltpu.MemorySpace.SMEM),
        ],
        out_specs=pl.BlockSpec((tile_n, nc_pad), lambda i: (i, 0)),
        compiler_params=pltpu.CompilerParams(
            dimension_semantics=("parallel",),
            vmem_limit_bytes=vmem_limit),
    )(feats_ld, agg_mat, jk_w1, params["jk_w2"], att_wjk, att_wx,
      params["out_w1"], out_w2p, params["scalars"])
    return out[:, :nclass]


def reference_forward(feats, params):
    """Pure-JAX f32 reference of the same forward (for correctness check)."""
    a_model, a_jk, a_out, att_b = [params["scalars"][i] for i in range(4)]
    hidden = params["jk_w2"].shape[0]
    x = jnp.sum(feats * params["agg_w"][:, None, :, :], axis=2)     # (H, N, D)
    h_hops, n_nodes, d = x.shape
    x_nodes = jnp.transpose(x, (1, 0, 2))
    x_cat = x_nodes.reshape(n_nodes, h_hops * d)
    h1 = _prelu(x_cat @ params["jk_w1"], a_jk) @ params["jk_w2"]
    jk = _prelu(h1, a_model)
    w_jk = params["att_w"][0, :hidden]
    w_x = params["att_w"][0, hidden:]
    scores = (jk @ w_jk)[:, None] + jnp.einsum("hnd,d->nh", x, w_x) + att_b
    scores = jnp.maximum(scores, 0.0)
    w_att = jax.nn.softmax(scores, axis=1)
    right = jnp.einsum("nhd,nh->nd", x_nodes, w_att)
    o = _prelu(right @ params["out_w1"], a_out) @ params["out_w2"]
    return o


def init_params(key, *, num_hops, num_feats, nfeat, hidden, nclass):
    ks = jax.random.split(key, 6)
    gain = float(np.sqrt(2.0))  # calculate_gain('relu')

    def xavier(k, shape, gain=1.0):
        fan_in, fan_out = shape[-2], shape[-1]
        bound = gain * np.sqrt(6.0 / (fan_in + fan_out))
        return jax.random.uniform(k, shape, jnp.float32, -bound, bound)

    def dense(k, shape):  # GAMLP Dense: U(-1/sqrt(out), 1/sqrt(out))
        stdv = 1.0 / np.sqrt(shape[1])
        return jax.random.uniform(k, shape, jnp.float32, -stdv, stdv)

    return {
        "agg_w": xavier(ks[0], (num_hops, num_feats, nfeat)),
        "jk_w1": dense(ks[1], (num_hops * nfeat, hidden)),
        "jk_w2": dense(ks[2], (hidden, hidden)),
        "att_w": xavier(ks[3], (1, hidden + nfeat), gain=gain),
        "out_w1": dense(ks[4], (nfeat, hidden)),
        "out_w2": dense(ks[5], (hidden, nclass)),
        # [model PReLU alpha, jk-FFN PReLU alpha, out-FFN PReLU alpha, att bias]
        "scalars": jnp.array([0.25, 0.25, 0.25, 0.0], dtype=jnp.float32),
    }


if __name__ == "__main__":
    # Small shapes: N nodes, num_hops hop features, num_feats relation subsets.
    # num_feats * nfeat = 128 -> lane-dense feats stream.
    N, num_hops, num_feats, nfeat, hidden, nclass = 256, 3, 4, 32, 32, 8

    key = jax.random.PRNGKey(0)
    k_feat, k_lab, k_par = jax.random.split(key, 3)

    # feats_dict (list of num_hops tensors (N, num_feats, nfeat)) stacked.
    feats = jax.random.normal(k_feat, (num_hops, N, num_feats, nfeat),
                              dtype=jnp.float32)
    label_emb = jax.random.normal(k_lab, (N, nclass), dtype=jnp.float32)

    params = init_params(k_par, num_hops=num_hops, num_feats=num_feats,
                         nfeat=nfeat, hidden=hidden, nclass=nclass)

    out = nars_jk_gamlp_forward(feats, label_emb, params)
    out = jax.block_until_ready(out)

    ref = jax.block_until_ready(reference_forward(feats, params))
    np.testing.assert_allclose(np.asarray(out), np.asarray(ref),
                               rtol=1e-2, atol=1e-2)

    print("KERNEL_OK")
</pallas_src>

<mosaic_0001>
module attributes {stable_mosaic.version = 11 : i64} {
  func.func @gamlp_kernel(%arg0: i32, %arg1: memref<3x128x128xbf16, #tpu.memory_space<vmem>>, %arg2: memref<3x128x32xbf16, #tpu.memory_space<vmem>>, %arg3: memref<3x32x32xf32, #tpu.memory_space<vmem>>, %arg4: memref<32x32xf32, #tpu.memory_space<vmem>>, %arg5: memref<32x1xf32, #tpu.memory_space<vmem>>, %arg6: memref<32x1xf32, #tpu.memory_space<vmem>>, %arg7: memref<32x32xf32, #tpu.memory_space<vmem>>, %arg8: memref<32x128xf32, #tpu.memory_space<vmem>>, %arg9: memref<4xf32, #tpu.memory_space<smem>>, %arg10: memref<128x128xf32, #tpu.memory_space<vmem>>) attributes {dimension_semantics = [#tpu.dimension_semantics<parallel>], iteration_bounds = array<i64: 2>, scalar_prefetch = 0 : i64, scratch_operands = 0 : i64, tpu.core_type = #tpu.core_type<tc>, window_params = [{transform_indices = @transform_0, window_bounds = array<i64: 3, 128, 128>}, {pipeline_mode = #tpu.pipeline_mode<synchronous>, transform_indices = @transform_1, window_bounds = array<i64: 3, 128, 32>}, {pipeline_mode = #tpu.pipeline_mode<synchronous>, transform_indices = @transform_2, window_bounds = array<i64: 3, 32, 32>}, {pipeline_mode = #tpu.pipeline_mode<synchronous>, transform_indices = @transform_3, window_bounds = array<i64: 32, 32>}, {pipeline_mode = #tpu.pipeline_mode<synchronous>, transform_indices = @transform_4, window_bounds = array<i64: 32, 1>}, {pipeline_mode = #tpu.pipeline_mode<synchronous>, transform_indices = @transform_5, window_bounds = array<i64: 32, 1>}, {pipeline_mode = #tpu.pipeline_mode<synchronous>, transform_indices = @transform_6, window_bounds = array<i64: 32, 32>}, {pipeline_mode = #tpu.pipeline_mode<synchronous>, transform_indices = @transform_7, window_bounds = array<i64: 32, 128>}, {transform_indices = @transform_8, window_bounds = array<i64: 4>}, {transform_indices = @transform_9, window_bounds = array<i64: 128, 128>}]} {
    %c0 = arith.constant 0 : index
    %0 = memref.load %arg9[%c0] : memref<4xf32, #tpu.memory_space<smem>>
    %c1 = arith.constant 1 : index
    %1 = memref.load %arg9[%c1] : memref<4xf32, #tpu.memory_space<smem>>
    %c2 = arith.constant 2 : index
    %2 = memref.load %arg9[%c2] : memref<4xf32, #tpu.memory_space<smem>>
    %c3 = arith.constant 3 : index
    %3 = memref.load %arg9[%c3] : memref<4xf32, #tpu.memory_space<smem>>
    %c0_0 = arith.constant 0 : index
    %c0_1 = arith.constant 0 : index
    %4 = vector.load %arg5[%c0_0, %c0_1] : memref<32x1xf32, #tpu.memory_space<vmem>>, vector<32x1xf32>
    %c0_2 = arith.constant 0 : index
    %c0_3 = arith.constant 0 : index
    %5 = vector.load %arg6[%c0_2, %c0_3] : memref<32x1xf32, #tpu.memory_space<vmem>>, vector<32x1xf32>
    %c0_4 = arith.constant 0 : index
    %c0_5 = arith.constant 0 : index
    %c0_6 = arith.constant 0 : index
    %6 = vector.load %arg1[%c0_4, %c0_5, %c0_6] : memref<3x128x128xbf16, #tpu.memory_space<vmem>>, vector<1x128x128xbf16>
    %7 = vector.shape_cast %6 : vector<1x128x128xbf16> to vector<128x128xbf16>
    %c0_7 = arith.constant 0 : index
    %c0_8 = arith.constant 0 : index
    %c0_9 = arith.constant 0 : index
    %8 = vector.load %arg2[%c0_7, %c0_8, %c0_9] : memref<3x128x32xbf16, #tpu.memory_space<vmem>>, vector<1x128x32xbf16>
    %9 = vector.shape_cast %8 : vector<1x128x32xbf16> to vector<128x32xbf16>
    %cst = arith.constant dense<0.000000e+00> : vector<128x32xf32>
    %10 = tpu.matmul %7, %9, %cst {dimension_numbers = #tpu.dot_dimension_numbers<[1], [0], [0], [1], [0, 0, 1, 1], [], []>} : vector<128x128xbf16>, vector<128x32xbf16>, vector<128x32xf32> -> vector<128x32xf32>
    %c0_10 = arith.constant 0 : index
    %c0_11 = arith.constant 0 : index
    %c0_12 = arith.constant 0 : index
    %11 = vector.load %arg3[%c0_10, %c0_11, %c0_12] : memref<3x32x32xf32, #tpu.memory_space<vmem>>, vector<1x32x32xf32>
    %12 = vector.shape_cast %11 : vector<1x32x32xf32> to vector<32x32xf32>
    %cst_13 = arith.constant dense<0.000000e+00> : vector<128x32xf32>
    %13 = tpu.matmul %10, %12, %cst_13 {dimension_numbers = #tpu.dot_dimension_numbers<[1], [0], [0], [1], [0, 0, 1, 1], [], []>} : vector<128x32xf32>, vector<32x32xf32>, vector<128x32xf32> -> vector<128x32xf32>
    %cst_14 = arith.constant dense<0.000000e+00> : vector<128x1xf32>
    %14 = tpu.matmul %10, %5, %cst_14 {dimension_numbers = #tpu.dot_dimension_numbers<[1], [0], [0], [1], [0, 0, 1, 1], [], []>} : vector<128x32xf32>, vector<32x1xf32>, vector<128x1xf32> -> vector<128x1xf32>
    %c1_15 = arith.constant 1 : index
    %c0_16 = arith.constant 0 : index
    %c0_17 = arith.constant 0 : index
    %15 = vector.load %arg1[%c1_15, %c0_16, %c0_17] : memref<3x128x128xbf16, #tpu.memory_space<vmem>>, vector<1x128x128xbf16>
    %16 = vector.shape_cast %15 : vector<1x128x128xbf16> to vector<128x128xbf16>
    %c1_18 = arith.constant 1 : index
    %c0_19 = arith.constant 0 : index
    %c0_20 = arith.constant 0 : index
    %17 = vector.load %arg2[%c1_18, %c0_19, %c0_20] : memref<3x128x32xbf16, #tpu.memory_space<vmem>>, vector<1x128x32xbf16>
    %18 = vector.shape_cast %17 : vector<1x128x32xbf16> to vector<128x32xbf16>
    %cst_21 = arith.constant dense<0.000000e+00> : vector<128x32xf32>
    %19 = tpu.matmul %16, %18, %cst_21 {dimension_numbers = #tpu.dot_dimension_numbers<[1], [0], [0], [1], [0, 0, 1, 1], [], []>} : vector<128x128xbf16>, vector<128x32xbf16>, vector<128x32xf32> -> vector<128x32xf32>
    %c1_22 = arith.constant 1 : index
    %c0_23 = arith.constant 0 : index
    %c0_24 = arith.constant 0 : index
    %20 = vector.load %arg3[%c1_22, %c0_23, %c0_24] : memref<3x32x32xf32, #tpu.memory_space<vmem>>, vector<1x32x32xf32>
    %21 = vector.shape_cast %20 : vector<1x32x32xf32> to vector<32x32xf32>
    %cst_25 = arith.constant dense<0.000000e+00> : vector<128x32xf32>
    %22 = tpu.matmul %19, %21, %cst_25 {dimension_numbers = #tpu.dot_dimension_numbers<[1], [0], [0], [1], [0, 0, 1, 1], [], []>} : vector<128x32xf32>, vector<32x32xf32>, vector<128x32xf32> -> vector<128x32xf32>
    %23 = arith.addf %13, %22 : vector<128x32xf32>
    %cst_26 = arith.constant dense<0.000000e+00> : vector<128x1xf32>
    %24 = tpu.matmul %19, %5, %cst_26 {dimension_numbers = #tpu.dot_dimension_numbers<[1], [0], [0], [1], [0, 0, 1, 1], [], []>} : vector<128x32xf32>, vector<32x1xf32>, vector<128x1xf32> -> vector<128x1xf32>
    %c2_27 = arith.constant 2 : index
    %c0_28 = arith.constant 0 : index
    %c0_29 = arith.constant 0 : index
    %25 = vector.load %arg1[%c2_27, %c0_28, %c0_29] : memref<3x128x128xbf16, #tpu.memory_space<vmem>>, vector<1x128x128xbf16>
    %26 = vector.shape_cast %25 : vector<1x128x128xbf16> to vector<128x128xbf16>
    %c2_30 = arith.constant 2 : index
    %c0_31 = arith.constant 0 : index
    %c0_32 = arith.constant 0 : index
    %27 = vector.load %arg2[%c2_30, %c0_31, %c0_32] : memref<3x128x32xbf16, #tpu.memory_space<vmem>>, vector<1x128x32xbf16>
    %28 = vector.shape_cast %27 : vector<1x128x32xbf16> to vector<128x32xbf16>
    %cst_33 = arith.constant dense<0.000000e+00> : vector<128x32xf32>
    %29 = tpu.matmul %26, %28, %cst_33 {dimension_numbers = #tpu.dot_dimension_numbers<[1], [0], [0], [1], [0, 0, 1, 1], [], []>} : vector<128x128xbf16>, vector<128x32xbf16>, vector<128x32xf32> -> vector<128x32xf32>
    %c2_34 = arith.constant 2 : index
    %c0_35 = arith.constant 0 : index
    %c0_36 = arith.constant 0 : index
    %30 = vector.load %arg3[%c2_34, %c0_35, %c0_36] : memref<3x32x32xf32, #tpu.memory_space<vmem>>, vector<1x32x32xf32>
    %31 = vector.shape_cast %30 : vector<1x32x32xf32> to vector<32x32xf32>
    %cst_37 = arith.constant dense<0.000000e+00> : vector<128x32xf32>
    %32 = tpu.matmul %29, %31, %cst_37 {dimension_numbers = #tpu.dot_dimension_numbers<[1], [0], [0], [1], [0, 0, 1, 1], [], []>} : vector<128x32xf32>, vector<32x32xf32>, vector<128x32xf32> -> vector<128x32xf32>
    %33 = arith.addf %23, %32 : vector<128x32xf32>
    %cst_38 = arith.constant dense<0.000000e+00> : vector<128x1xf32>
    %34 = tpu.matmul %29, %5, %cst_38 {dimension_numbers = #tpu.dot_dimension_numbers<[1], [0], [0], [1], [0, 0, 1, 1], [], []>} : vector<128x32xf32>, vector<32x1xf32>, vector<128x1xf32> -> vector<128x1xf32>
    %cst_39 = arith.constant 0.000000e+00 : f32
    %35 = vector.broadcast %cst_39 : f32 to vector<128x32xf32>
    %36 = arith.cmpf oge, %33, %35 : vector<128x32xf32>
    %37 = vector.broadcast %1 : f32 to vector<128x32xf32>
    %38 = arith.mulf %37, %33 : vector<128x32xf32>
    %39 = arith.select %36, %33, %38 : vector<128x32xi1>, vector<128x32xf32>
    %c0_40 = arith.constant 0 : index
    %c0_41 = arith.constant 0 : index
    %40 = vector.load %arg4[%c0_40, %c0_41] : memref<32x32xf32, #tpu.memory_space<vmem>>, vector<32x32xf32>
    %cst_42 = arith.constant dense<0.000000e+00> : vector<128x32xf32>
    %41 = tpu.matmul %39, %40, %cst_42 {dimension_numbers = #tpu.dot_dimension_numbers<[1], [0], [0], [1], [0, 0, 1, 1], [], []>} : vector<128x32xf32>, vector<32x32xf32>, vector<128x32xf32> -> vector<128x32xf32>
    %cst_43 = arith.constant 0.000000e+00 : f32
    %42 = vector.broadcast %cst_43 : f32 to vector<128x32xf32>
    %43 = arith.cmpf oge, %41, %42 : vector<128x32xf32>
    %44 = vector.broadcast %0 : f32 to vector<128x32xf32>
    %45 = arith.mulf %44, %41 : vector<128x32xf32>
    %46 = arith.select %43, %41, %45 : vector<128x32xi1>, vector<128x32xf32>
    %cst_44 = arith.constant dense<0.000000e+00> : vector<128x1xf32>
    %47 = tpu.matmul %46, %4, %cst_44 {dimension_numbers = #tpu.dot_dimension_numbers<[1], [0], [0], [1], [0, 0, 1, 1], [], []>} : vector<128x32xf32>, vector<32x1xf32>, vector<128x1xf32> -> vector<128x1xf32>
    %48 = arith.addf %47, %14 : vector<128x1xf32>
    %49 = vector.broadcast %3 : f32 to vector<128x1xf32>
    %50 = arith.addf %48, %49 : vector<128x1xf32>
    %cst_45 = arith.constant 0.000000e+00 : f32
    %51 = vector.broadcast %cst_45 : f32 to vector<128x1xf32>
    %52 = arith.maximumf %50, %51 : vector<128x1xf32>
    %53 = arith.addf %47, %24 : vector<128x1xf32>
    %54 = vector.broadcast %3 : f32 to vector<128x1xf32>
    %55 = arith.addf %53, %54 : vector<128x1xf32>
    %cst_46 = arith.constant 0.000000e+00 : f32
    %56 = vector.broadcast %cst_46 : f32 to vector<128x1xf32>
    %57 = arith.maximumf %55, %56 : vector<128x1xf32>
    %58 = arith.addf %47, %34 : vector<128x1xf32>
    %59 = vector.broadcast %3 : f32 to vector<128x1xf32>
    %60 = arith.addf %58, %59 : vector<128x1xf32>
    %cst_47 = arith.constant 0.000000e+00 : f32
    %61 = vector.broadcast %cst_47 : f32 to vector<128x1xf32>
    %62 = arith.maximumf %60, %61 : vector<128x1xf32>
    %63 = arith.maximumf %52, %57 : vector<128x1xf32>
    %64 = arith.maximumf %63, %62 : vector<128x1xf32>
    %65 = arith.subf %52, %64 : vector<128x1xf32>
    %66 = math.exp %65 : vector<128x1xf32>
    %67 = arith.subf %57, %64 : vector<128x1xf32>
    %68 = math.exp %67 : vector<128x1xf32>
    %69 = arith.subf %62, %64 : vector<128x1xf32>
    %70 = math.exp %69 : vector<128x1xf32>
    %71 = arith.addf %66, %68 : vector<128x1xf32>
    %72 = arith.addf %71, %70 : vector<128x1xf32>
    %73 = tpu.reciprocal %72 {approx = true} : vector<128x1xf32> -> vector<128x1xf32>
    %74 = arith.mulf %66, %73 : vector<128x1xf32>
    %75 = vector.broadcast %74 : vector<128x1xf32> to vector<128x32xf32>
    %76 = arith.mulf %10, %75 : vector<128x32xf32>
    %77 = arith.mulf %68, %73 : vector<128x1xf32>
    %78 = vector.broadcast %77 : vector<128x1xf32> to vector<128x32xf32>
    %79 = arith.mulf %19, %78 : vector<128x32xf32>
    %80 = arith.addf %76, %79 : vector<128x32xf32>
    %81 = arith.mulf %70, %73 : vector<128x1xf32>
    %82 = vector.broadcast %81 : vector<128x1xf32> to vector<128x32xf32>
    %83 = arith.mulf %29, %82 : vector<128x32xf32>
    %84 = arith.addf %80, %83 : vector<128x32xf32>
    %c0_48 = arith.constant 0 : index
    %c0_49 = arith.constant 0 : index
    %85 = vector.load %arg7[%c0_48, %c0_49] : memref<32x32xf32, #tpu.memory_space<vmem>>, vector<32x32xf32>
    %cst_50 = arith.constant dense<0.000000e+00> : vector<128x32xf32>
    %86 = tpu.matmul %84, %85, %cst_50 {dimension_numbers = #tpu.dot_dimension_numbers<[1], [0], [0], [1], [0, 0, 1, 1], [], []>} : vector<128x32xf32>, vector<32x32xf32>, vector<128x32xf32> -> vector<128x32xf32>
    %cst_51 = arith.constant 0.000000e+00 : f32
    %87 = vector.broadcast %cst_51 : f32 to vector<128x32xf32>
    %88 = arith.cmpf oge, %86, %87 : vector<128x32xf32>
    %89 = vector.broadcast %2 : f32 to vector<128x32xf32>
    %90 = arith.mulf %89, %86 : vector<128x32xf32>
    %91 = arith.select %88, %86, %90 : vector<128x32xi1>, vector<128x32xf32>
    %c0_52 = arith.constant 0 : index
    %c0_53 = arith.constant 0 : index
    %92 = vector.load %arg8[%c0_52, %c0_53] : memref<32x128xf32, #tpu.memory_space<vmem>>, vector<32x128xf32>
    %cst_54 = arith.constant dense<0.000000e+00> : vector<128x128xf32>
    %93 = tpu.matmul %91, %92, %cst_54 {dimension_numbers = #tpu.dot_dimension_numbers<[1], [0], [0], [1], [0, 0, 1, 1], [], []>} : vector<128x32xf32>, vector<32x128xf32>, vector<128x128xf32> -> vector<128x128xf32>
    %c0_55 = arith.constant 0 : index
    %c0_56 = arith.constant 0 : index
    %94 = vector.load %arg10[%c0_55, %c0_56] : memref<128x128xf32, #tpu.memory_space<vmem>>, vector<128x128xf32>
    tpu.vector_store %arg10[%c0_55, %c0_56], %93 {strides = array<i32>} : memref<128x128xf32, #tpu.memory_space<vmem>>, vector<128x128xf32>,
    return
  }
  func.func @transform_0(%arg0: i32) -> (i32, i32, i32) {
    %c0_i32 = arith.constant 0 : i32
    %c0_i32_0 = arith.constant 0 : i32
    %c0_i32_1 = arith.constant 0 : i32
    return %c0_i32, %arg0, %c0_i32_0 : i32, i32, i32
  }
  func.func @transform_1(%arg0: i32) -> (i32, i32, i32) {
    %c0_i32 = arith.constant 0 : i32
    %c0_i32_0 = arith.constant 0 : i32
    %c0_i32_1 = arith.constant 0 : i32
    %c0_i32_2 = arith.constant 0 : i32
    return %c0_i32, %c0_i32_0, %c0_i32_1 : i32, i32, i32
  }
  func.func @transform_2(%arg0: i32) -> (i32, i32, i32) {
    %c0_i32 = arith.constant 0 : i32
    %c0_i32_0 = arith.constant 0 : i32
    %c0_i32_1 = arith.constant 0 : i32
    %c0_i32_2 = arith.constant 0 : i32
    return %c0_i32, %c0_i32_0, %c0_i32_1 : i32, i32, i32
  }
  func.func @transform_3(%arg0: i32) -> (i32, i32) {
    %c0_i32 = arith.constant 0 : i32
    %c0_i32_0 = arith.constant 0 : i32
    %c0_i32_1 = arith.constant 0 : i32
    return %c0_i32, %c0_i32_0 : i32, i32
  }
  func.func @transform_4(%arg0: i32) -> (i32, i32) {
    %c0_i32 = arith.constant 0 : i32
    %c0_i32_0 = arith.constant 0 : i32
    %c0_i32_1 = arith.constant 0 : i32
    return %c0_i32, %c0_i32_0 : i32, i32
  }
  func.func @transform_5(%arg0: i32) -> (i32, i32) {
    %c0_i32 = arith.constant 0 : i32
    %c0_i32_0 = arith.constant 0 : i32
    %c0_i32_1 = arith.constant 0 : i32
    return %c0_i32, %c0_i32_0 : i32, i32
  }
  func.func @transform_6(%arg0: i32) -> (i32, i32) {
    %c0_i32 = arith.constant 0 : i32
    %c0_i32_0 = arith.constant 0 : i32
    %c0_i32_1 = arith.constant 0 : i32
    return %c0_i32, %c0_i32_0 : i32, i32
  }
  func.func @transform_7(%arg0: i32) -> (i32, i32) {
    %c0_i32 = arith.constant 0 : i32
    %c0_i32_0 = arith.constant 0 : i32
    %c0_i32_1 = arith.constant 0 : i32
    return %c0_i32, %c0_i32_0 : i32, i32
  }
  func.func @transform_8(%arg0: i32) -> i32 {
    %c0_i32 = arith.constant 0 : i32
    %c0_i32_0 = arith.constant 0 : i32
    return %c0_i32 : i32
  }
  func.func @transform_9(%arg0: i32) -> (i32, i32) {
    %c0_i32 = arith.constant 0 : i32
    %c0_i32_0 = arith.constant 0 : i32
    return %arg0, %c0_i32 : i32, i32
  }
}

</mosaic_0001>

<bundles_post_ra>
// kernel: tpu_custom_call.1
= control target key start
LH: loop header
LB: loop body
LE: loop exit
PB: predicated region body
PF: predicated region fallthrough
CT: control target
= control target key end

     0   :  { %s6753_s0 = inlined_call_operand.hbm [shape: bf16[3,256,128], index: 0, kind: input, shape index: {}]   ;;  %s6754_s1 = inlined_call_operand.vmem [shape: bf16[3,128,32], index: 1, kind: input, shape index: {}]   ;;  %s6755_s2 = inlined_call_operand.vmem [shape: f32[3,32,32], index: 2, kind: input, shape index: {}]   ;;  %s6756_s3 = inlined_call_operand.vmem [shape: f32[32,32], index: 3, kind: input, shape index: {}]   ;;  %s6757_s4 = inlined_call_operand.vmem [shape: f32[32,1], index: 4, kind: input, shape index: {}]   ;;  %s6758_s5 = inlined_call_operand.vmem [shape: f32[32,1], index: 5, kind: input, shape index: {}]   ;;  %s6759_s6 = inlined_call_operand.vmem [shape: f32[32,32], index: 6, kind: input, shape index: {}]   ;;  %s6760_s7 = inlined_call_operand.vmem [shape: f32[32,128], index: 7, kind: input, shape index: {}]   ;;  %s6761_s8 = inlined_call_operand.vmem [shape: f32[4], index: 8, kind: input, shape index: {}]   ;;  %s6762_s9 = inlined_call_operand.hbm [shape: f32[256,128], index: 9, kind: output, shape index: {}]  }
   0x1   :  { %6821 = sst [smem:[#allocation75_spill]] %s6761_s8 }
   0x2   :  { %14 = vsyncpa [#allocation3], 0 }
   0x3   :  { %16 = vsyncpa [#allocation3 + $0x1], 0 }
   0x4   :  { %17 = vsyncpa [#allocation5], 0 }
   0x5   :  { %18 = vsyncpa [#allocation4], 0 }
   0x6   :  { %20 = vsyncpa [#allocation4 + $0x1], 0  ;;  %s5389_s30 = smov 0   ;;  %s5391_s10 = smov 0  }
   0x7   :  { %s5393_s11 = smov 0   ;;  %s5395_s12 = smov 0  }
   0x8 LB: > { %6822 = sst [smem:[#allocation14_spill]] %s5322_s11  ;;  %s5410_s13 = sadd.s32 4294967295, %s5326_s12   ;;  %s5326_s12 = sphi %s5395_s12, %s6954_s12   ;;  %s5322_s11 = sphi %s5393_s11, %s6956_s11   ;;  %s5318_s10 = sphi %s5391_s10, %s6958_s10   ;;  %s5314_s30 = sphi %s5389_s30, %s6957_s30  }
   0x9   : > { %6823 = sst [smem:[#allocation15_spill]] %s5326_s12  ;;  %s3912_s14 = sadd.s32 4294967294, %s5326_s12  }
   0xa   : > { %s5414_s15 = sadd.s32 1, %s5326_s12   ;;  %s33_s16 = sadd.s32 1, %s5322_s11 }
   0xb   : > { %6824 = sst [smem:[#allocation16_spill]] %s5414_s15  ;;  %s30_s17 = ssub.s32 %s5326_s12, %s5414_s15 }
   0xc   : > { %p40_p0 = scmp.ne.s32.totalorder %s5322_s11, %s5318_s10  ;;  %p31_p1 = scmp.eq.s32.totalorder %s30_s17, 0 }
   0xd   : > { %p41_p2 = scmp.eq.s32.totalorder %s5326_s12, 0  ;;  %p46_p3 = scmp.ne.s32.totalorder %s5318_s10, %s5314_s30 }
   0xe   : > { %p47_p4 = scmp.eq.s32.totalorder %s5410_s13, 0  ;;  %p238_p7 = scmp.eq.s32.totalorder %s5410_s13, 1 }
   0xf   : > { %s5426_s18 = scalar_select %p31_p1, %s5322_s11, %s33_s16  }
  0x10   : > { %p5428_p5 = por %p41_p2, %p40_p0  ;;  %p5434_p6 = por %p47_p4, %p46_p3 }
  0x11   : > { %6825 = sst [smem:[#allocation17_spill]] %s5426_s18  ;;  %p244_p8 = scmp.eq.s32.totalorder %s3912_s14, 1 }
  0x12   : > { %s6827_s20 = scalar_select %p5434_p6, 1, 0 }
  0x13   : > { %p3913_p9 = scmp.ge.s32.totalorder %s5326_s12, 1  ;;  %p251_p10 = scmp.lt.s32.totalorder %s5326_s12, 3 }
  0x14   : > { %p5441_p11 = por %p238_p7, %p40_p0  ;;  %p5445_p12 = por %p244_p8, %p46_p3 }
  0x15   : > { %p5449_p13 = pnand %p3913_p9, %p251_p10  ;;  %s6831_s8 = sld [smem:[#allocation75_spill]] }
  0x16   : > { %s6828_s21 = scalar_select %p5441_p11, 1, 0 }
  0x17   : > { %s6829_s22 = scalar_select %p5445_p12, 1, 0 }
  0x18   : > { %p5010_p1 = pneg %p5449_p13 }
  0x1a   : > { %p5011_p0 = pnand %p5010_p1, %p47_p4 }
  0x1b   : > { %s285_s26 = sshll.u32 %s6831_s8, 4  ;;  %s286_s26 = int_to_ptr.vmem [resolvable:$true] %s285_s26 }
  0x1c   : > { %s5241_s27 = scalar_lea.vmem %s286_s26, 16  ;;  %p5243_p3 = pneg %p5011_p0 }
  0x1d   : > { %p5242_p2 = scmp.ne.s32.totalorder %s286_s26, %s5241_s27  ;;  %p5249_p12 = scmp.lt.s32.totalorder %s286_s26, %s286_s26 }
  0x1e   : > { %p5250_p9 = scmp.lt.s32.totalorder %s5241_s27, %s5241_s27 }
  0x1f   : > { %p5244_p7 = pnand %p5243_p3, %p5242_p2 }
  0x20   : > { %p5251_p10 = por %p5250_p9, %p5249_p12 }
  0x21   : > { %p5245_p8 = pneg %p5244_p7 }
  0x23   : > { %p5252_p11 = pnand %p5251_p10, %p5245_p8 }
  0x25   : > { %5255 = shalt.err (!%p5252_p11)
}
  0x26   : > { %s5328_s28 = smov [#allocation6]   ;;  %p3915_p6 = scmp.ge.s32.totalorder %s5326_s12, 2 }
  0x27   : > { %5013 = dma.vmem_to_smem (!%p5011_p0), %s286_s26, 16, %s5328_s28, [#allocation5]  }
  0x28   : > { %292 = sbr.rel (%p3915_p6) target bundleno = 61 (0x3d), region = 48 }
  0x2f   : > { %s296_s29 = sand.u32 1, %s5322_s11   ;;  %s4211_s16 = sshll.u32 %s5326_s12, 10 }
  0x30   : > { %s4993_s14 = smul.u32 192, %s296_s29  ;;  %s5329_s17 = smov 2048  }
  0x31   : > { %4998 = sst [smem:[#allocation9]] (%p5428_p5), %s5329_s17  ;;  %s306_s27 = scalar_lea.hbm %s6753_s0, %s4211_s16 }
  0x32   : > { %s4997_s24 = scalar_select %p5428_p5, [#allocation0], [#allocation10] }
  0x33   : > { %s300_s8 = scalar_lea.vmem [#allocation2], %s4993_s14  ;;  %s5330_s15 = smov 1024  }
  0x34   : > { %s311_s28 = sld [smem:[%s4997_s24]]   ;;  %s319_s18 = sshll.u32 %s300_s8, 4  ;;  %s320_s18 = int_to_ptr.vmem [resolvable:$true] %s319_s18 }
  0x35   : > { %4999 = sst [smem:[#allocation9 + $0x1]] (%p5428_p5), %s5330_s15  ;;  %s5331_s11 = smov 16  }
  0x36   : > { %5000 = sst [smem:[#allocation9 + $0x2]] (%p5428_p5), %s5331_s11  ;;  %s5332_s12 = smov 64  }
  0x37   : > { %5001 = sst [smem:[#allocation9 + $0x3]] (%p5428_p5), %s5332_s12  ;;  %s5333_s17 = smov 4  }
  0x38   : > { %5002 = sst [smem:[#allocation9 + $0x4]] (%p5428_p5), %s5332_s12  ;;  %s297_s14 = scalar_lea.sflag [#allocation3], %s296_s29 }
  0x39   : > { %5003 = sst [smem:[#allocation9 + $0x5]] (%p5428_p5), %s5333_s17  ;;  %s5334_s25 = smov [#allocation8]  }
  0x3a   : > { %s3918_s16 = sshll.u32 %s311_s28, 26 }
  0x3b   : > { %s3919_s24 = sadd.s32 134217728, %s3918_s16 }
  0x3c   : > { %5004 = dma.general (%p5428_p5), %s306_s27, 3072, %s320_s18, %s297_s14, %s5334_s25, [#allocation9], %s3919_s24, 0  }
  0x3d PF: > { %344 = sbr.rel (%p5449_p13) target bundleno = 2219 (0x8ab), region = 56 }
  0x44   : > { %s5487_s8 = sand.u32 1, %s5318_s10   ;;  %p6832_p11 = scmp.ne.s32.totalorder %s6827_s20, 0 }
  0x45   : > { %s4994_s11 = smul.u32 192, %s5487_s8  ;;  %s347_s12 = scalar_lea.sflag [#allocation3], %s5487_s8 }
  0x47   : > { %s5491_s15 = scalar_lea.vmem [#allocation2], %s4994_s11 }
  0x48   : > { %5301 = dma.done.wait (%p6832_p11), %s347_s12, 3072  }
  0x49   : > { %5303 = vsyncadd (%p6832_p11), %s347_s12, 4294964224 }
  0x4a   : > { %5305 = dma.done.wait (%p47_p4), [#allocation5], 16  }
  0x4b   : > { %5307 = vsyncadd (%p47_p4), [#allocation5], 4294967280 }
  0x4c   : > { %359 = sfence }
  0x4d   : > { %v5065_v0 = vld [vmem:[%s6754_s1] sm:$0xff]   ;;  %v5066_v1 = vld [vmem:[%s6754_s1 + $0x8] sm:$0xff]   ;;  %v5067_v2 = vld [vmem:[%s6754_s1 + $0x10] sm:$0xff]   ;;  %vm634_vm0 = vcmask 261120   ;;  %s3923_s20 = sld [smem:[#allocation6 + $0x1]]  ;;  %s393_s26 = sld [smem:[#allocation6]] }
  0x4e   : > { %4461 = vmatprep.subr.bf16.mxu0 %v5065_v0  ;;  %v5068_v3 = vld [vmem:[%s6754_s1 + $0x18] sm:$0xff]   ;;  %v5073_v4 = vld [vmem:[%s5491_s15] sm:$0xff]   ;;  %v5070_v6 = vld [vmem:[%s6754_s1 + $0x28] sm:$0xff]   ;;  %s3925_s27 = sld [smem:[#allocation6 + $0x3]]  ;;  %s3924_s28 = sld [smem:[#allocation6 + $0x2]] }
  0x4f   : > { %4462 = vmatpush3.bf16.msra.mxu0 %v5065_v0  ;;  %4477 = vmatprep.mubr.bf16.mxu0 %v5073_v4  ;;  %v5069_v5 = vld [vmem:[%s6754_s1 + $0x20] sm:$0xff]   ;;  %v402_v8 = vld [vmem:[%s6758_s5 + $0x8] sm:$0xff]  ;;  %v403_v9 = vld [vmem:[%s6758_s5 + $0x10] sm:$0xff]  ;;  %s3922_s17 = sshll.u32 %s5487_s8, 7  ;;  %s4212_s24 = sshll.u32 %s5410_s13, 11 }
  0x50   : > { %4463 = vmatprep.subr.bf16.mxu0 %v5066_v1  ;;  %v401_v7 = vld [vmem:[%s6758_s5] sm:$0xff]  ;;  %v404_v11 = vld [vmem:[%s6758_s5 + $0x18] sm:$0xff]  ;;  %v5071_v12 = vld [vmem:[%s6754_s1 + $0x30] sm:$0xff]   ;;  %s6684_s16 = scalar_lea.vmem [#allocation7], %s3922_s17  ;;  %s6705_s12 = scalar_lea.hbm %s6762_s9, %s4212_s24 }
  0x51   : > { %v5529_v10 = vpack.c.bf16 %v402_v8, %v401_v7  ;;  %v5537_v13 = vpack.c.bf16 %v404_v11, %v403_v9  ;;  %v5072_v14 = vld [vmem:[%s6754_s1 + $0x38] sm:$0xff]   ;;  %v5074_v15 = vld [vmem:[%s5491_s15 + $0x8] sm:$0xff]   ;;  %v5075_v16 = vld [vmem:[%s5491_s15 + $0x10] sm:$0xff]   ;;  %s3827_s14 = sshll.u32 %s6684_s16, 4  ;;  %s3814_s18 = scalar_lea.sflag [#allocation4], %s5487_s8  ;;  %s6707_s14 = int_to_ptr.vmem [resolvable:$true] %s3827_s14 }
  0x52   : > { %v5076_v17 = vld [vmem:[%s5491_s15 + $0x18] sm:$0xff]   ;;  %v5077_v18 = vld [vmem:[%s5491_s15 + $0x20] sm:$0xff]   ;;  %v5078_v19 = vld [vmem:[%s5491_s15 + $0x28] sm:$0xff]   ;;  %p6951_p5 = scmp.ne.s32.totalorder %s6828_s21, 0  ;;  %s5336_s13 = smov [#allocation7]  }
  0x53   : > { %4464 = vmatpush3.bf16.msra.mxu0 %v5066_v1  ;;  %4878 = vmatprep.subr.bf16.mxu1 %v5529_v10  ;;  %v5079_v20 = vld [vmem:[%s5491_s15 + $0x30] sm:$0xff]   ;;  %v5080_v21 = vld [vmem:[%s5491_s15 + $0x38] sm:$0xff]   ;;  %v5081_v22 = vld [vmem:[%s6754_s1 + $0x40] sm:$0xff]   ;;  %s5260_s19 = sshll.u32 %s5336_s13, 4  ;;  %s5261_s19 = int_to_ptr.vmem [resolvable:$false] %s5260_s19 }
  0x54   : > { %4465 = vmatprep.subr.bf16.mxu0 %v5067_v2  ;;  %4880 = vmatpush3.bf16.msra.mxu1 %v5529_v10  ;;  %v5082_v26 = vld [vmem:[%s6754_s1 + $0x48] sm:$0xff]   ;;  %v5083_v28 = vld [vmem:[%s6754_s1 + $0x50] sm:$0xff]   ;;  %v5084_v32 = vld [vmem:[%s6754_s1 + $0x58] sm:$0xff]   ;;  %s5262_s23 = scalar_lea.vmem %s5261_s19, 4096  ;;  %p5263_p1 = scmp.lt.s32.totalorder %s6707_s14, %s5261_s19 }
  0x55   : > { %4882 = vmatprep.subr.bf16.mxu1 %v5537_v13  ;;  %v5085_v34 = vld [vmem:[%s6754_s1 + $0x60] sm:$0xff]   ;;  %v5086_v38 = vld [vmem:[%s6754_s1 + $0x68] sm:$0xff]   ;;  %v5087_v40 = vld [vmem:[%s6754_s1 + $0x70] sm:$0xff]  }
  0x56   : > { %v5088_v44 = vld [vmem:[%s6754_s1 + $0x78] sm:$0xff]   ;;  %v5089_v46 = vld [vmem:[%s5491_s15 + $0x40] sm:$0xff]   ;;  %v5090_v47 = vld [vmem:[%s5491_s15 + $0x48] sm:$0xff]  }
  0x57   : > { %4466 = vmatpush3.bf16.msra.mxu0 %v5067_v2  ;;  %v5091_v48 = vld [vmem:[%s5491_s15 + $0x50] sm:$0xff]   ;;  %v5092_v49 = vld [vmem:[%s5491_s15 + $0x58] sm:$0xff]   ;;  %v5093_v50 = vld [vmem:[%s5491_s15 + $0x60] sm:$0xff]  }
  0x58   : > { %4467 = vmatprep.subr.bf16.mxu0 %v5068_v3  ;;  %4884 = vmatpush3.bf16.msra.mxu1 %v5537_v13  ;;  %v5094_v51 = vld [vmem:[%s5491_s15 + $0x68] sm:$0xff]   ;;  %v5095_v52 = vld [vmem:[%s5491_s15 + $0x70] sm:$0xff]   ;;  %v5096_v53 = vld [vmem:[%s5491_s15 + $0x78] sm:$0xff]  }
  0x59   : > { %4525 = vmatprep.subr.bf16.mxu1 %v5081_v22  ;;  %v4006_v54 = vld [vmem:[%s6755_s2 + $0x20] sm:$0xff]  ;;  %v4007_v55 = vld [vmem:[%s6755_s2 + $0x28] sm:$0xff]  ;;  %v4008_v57 = vld [vmem:[%s6755_s2 + $0x30] sm:$0xff] }
  0x5a   : > { %v4885_v56 = vpack.c.bf16 %v4007_v55, %v4006_v54  ;;  %v4009_v58 = vld [vmem:[%s6755_s2 + $0x38] sm:$0xff]  ;;  %v5097_v60 = vld [vmem:[%s6754_s1 + $0x80] sm:$0xff]   ;;  %v631_v62 = vld [vmem:[%s6755_s2 + $0x8] sm:$0xff] }
  0x5b   : > { %4468 = vmatpush3.bf16.msra.mxu0 %v5068_v3  ;;  %v4889_v59 = vpack.c.bf16 %v4009_v58, %v4008_v57  ;;  %v630_v61 = vld [vmem:[%s6755_s2] sm:$0xff]  ;;  %v5103_v54 = vld [vmem:[%s6754_s1 + $0xb0] sm:$0xff]   ;;  %v5104_v58 = vld [vmem:[%s6754_s1 + $0xb8] sm:$0xff]  }
  0x5c   : > { %4469 = vmatprep.subr.bf16.mxu0 %v5069_v5  ;;  %v4893_v63 = vpack.c.bf16 %v631_v62, %v630_v61  ;;  %v5106_v61 = vld [vmem:[%s5491_s15 + $0x88] sm:$0xff]   ;;  %v5107_v62 = vld [vmem:[%s5491_s15 + $0x90] sm:$0xff]  }
  0x5f   : > { %4470 = vmatpush3.bf16.msra.mxu0 %v5069_v5 }
  0x60   : > { %4471 = vmatprep.subr.bf16.mxu0 %v5070_v6 }
  0x63   : > { %4472 = vmatpush3.bf16.msra.mxu0 %v5070_v6 }
  0x64   : > { %4473 = vmatprep.subr.bf16.mxu0 %v5071_v12 }
  0x67   : > { %4474 = vmatpush3.bf16.msra.mxu0 %v5071_v12 }
  0x68   : > { %4475 = vmatprep.subr.bf16.mxu0 %v5072_v14 }
  0x6b   : > { %4476 = vmatpush3.bf16.msra.mxu0 %v5072_v14 }
  0x6c   : > { %4886 = vmatprep.subr.bf16.mxu0 %v4885_v56 }
  0x6e   : > { %4478 = vmatmul.mubr.bf16.vlgmr.msra.gmra.mrb[0].mxu0 %v5074_v15 }
  0x6f   : > { %4481 = vmatprep.mubr.bf16.mxu0 %v5075_v16  ;;  %4888 = vmatpush3.bf16.msra.mxu0 %v4885_v56 }
  0x70   : > { %4890 = vmatprep.subr.bf16.mxu0 %v4889_v59 }
  0x73   : > { %4892 = vmatpush3.bf16.msra.mxu0 %v4889_v59 }
  0x74   : > { %4894 = vmatprep.subr.bf16.mxu0 %v4893_v63 }
  0x76   : > { %4482 = vmatmul.mubr.bf16.gmra.mrb[4].mxu0 %v5076_v17 }
  0x77   : > { %4485 = vmatprep.mubr.bf16.mxu0 %v5077_v18 }
  0x7e   : > { %4486 = vmatmul.mubr.bf16.gmra.mrb[8].mxu0 %v5078_v19 }
  0x7f   : > { %4489 = vmatprep.mubr.bf16.mxu0 %v5079_v20 }
  0x86   : > { %4490 = vmatmul.mubr.bf16.gmra.mrb[12].mxu0 %v5080_v21  ;;  %v5098_v21 = vld [vmem:[%s6754_s1 + $0x88] sm:$0xff]  }
 0x141   : > { %v5556_v23 = vpop.f32.mrb[0].mxu0 }
 0x142   : > { %6833 = vst [vmem:[#allocation18_spill] sm:$0xff] %v5556_v23  ;;  %v5558_v24 = vpop.f32.mrb[1].mxu0 }
 0x143   : > { %6834 = vst [vmem:[#allocation19_spill] sm:$0xff] %v5558_v24  ;;  %v5560_v25 = vpop.f32.mrb[2].mxu0  ;;  %4501 = vmatprep.mubr.msk.f32.mxu1 %vm634_vm0, %v5558_v24 }
 0x144   : > { %6835 = vst [vmem:[#allocation20_spill] sm:$0xff] %v5560_v25  ;;  %v5567_v27 = vpop.f32.mrb[3].mxu0 }
 0x145   : > { %6836 = vst [vmem:[#allocation21_spill] sm:$0xff] %v5567_v27  ;;  %4502 = vmatmul.mubr.msk.f32.vlgmr.msra.gmra.mrb[0].mxu1 %vm634_vm0, %v5567_v27 }
 0x146   : > { %4526 = vmatpush3.bf16.msra.mxu1 %v5081_v22  ;;  %4504 = vmatprep.mubr.msk.f32.mxu1 %vm634_vm0, %v5556_v23  ;;  %v632_v22 = vld [vmem:[%s6755_s2 + $0x10] sm:$0xff] }
 0x147   : > { %4527 = vmatprep.subr.bf16.mxu1 %v5082_v26 }
 0x149   : > { %v5576_v29 = vpop.f32.mrb[4].mxu0  ;;  %4505 = vmatmul.mubr.msk.f32.gmra.mrb[2].mxu1 %vm634_vm0, %v5560_v25 }
 0x14a   : > { %6837 = vst [vmem:[#allocation22_spill] sm:$0xff] %v5576_v29  ;;  %4528 = vmatpush3.bf16.msra.mxu1 %v5082_v26  ;;  %v5580_v30 = vpop.f32.mrb[5].mxu0  ;;  %v633_v26 = vld [vmem:[%s6755_s2 + $0x18] sm:$0xff] }
 0x14b   : > { %6838 = vst [vmem:[#allocation23_spill] sm:$0xff] %v5580_v30  ;;  %v5582_v31 = vpop.f32.mrb[6].mxu0  ;;  %4507 = vmatprep.mubr.msk.f32.mxu1 %vm634_vm0, %v5580_v30  ;;  %4529 = vmatprep.subr.bf16.mxu1 %v5083_v28 }
 0x14c   : > { %6839 = vst [vmem:[#allocation24_spill] sm:$0xff] %v5582_v31  ;;  %v5589_v33 = vpop.f32.mrb[7].mxu0 }
 0x14d   : > { %6840 = vst [vmem:[#allocation25_spill] sm:$0xff] %v5589_v33  ;;  %4508 = vmatmul.mubr.msk.f32.gmra.mrb[4].mxu1 %vm634_vm0, %v5589_v33 }
 0x14e   : > { %4530 = vmatpush3.bf16.msra.mxu1 %v5083_v28  ;;  %4510 = vmatprep.mubr.msk.f32.mxu1 %vm634_vm0, %v5576_v29 }
 0x14f   : > { %4531 = vmatprep.subr.bf16.mxu1 %v5084_v32 }
 0x151   : > { %v5598_v35 = vpop.f32.mrb[8].mxu0  ;;  %4511 = vmatmul.mubr.msk.f32.gmra.mrb[6].mxu1 %vm634_vm0, %v5582_v31 }
 0x152   : > { %6841 = vst [vmem:[#allocation26_spill] sm:$0xff] %v5598_v35  ;;  %4532 = vmatpush3.bf16.msra.mxu1 %v5084_v32  ;;  %v5602_v36 = vpop.f32.mrb[9].mxu0  ;;  %v4897_v32 = vpack.c.bf16 %v633_v26, %v632_v22  ;;  %v5111_v22 = vld [vmem:[%s5491_s15 + $0xb0] sm:$0xff]   ;;  %v4106_v26 = vld [vmem:[%s6755_s2 + $0x40] sm:$0xff] }
 0x153   : > { %6842 = vst [vmem:[#allocation27_spill] sm:$0xff] %v5602_v36  ;;  %v5604_v37 = vpop.f32.mrb[10].mxu0  ;;  %4513 = vmatprep.mubr.msk.f32.mxu1 %vm634_vm0, %v5602_v36  ;;  %4533 = vmatprep.subr.bf16.mxu1 %v5085_v34 }
 0x154   : > { %6843 = vst [vmem:[#allocation28_spill] sm:$0xff] %v5604_v37  ;;  %v5611_v39 = vpop.f32.mrb[11].mxu0 }
 0x155   : > { %6844 = vst [vmem:[#allocation29_spill] sm:$0xff] %v5611_v39  ;;  %4514 = vmatmul.mubr.msk.f32.gmra.mrb[8].mxu1 %vm634_vm0, %v5611_v39 }
 0x156   : > { %4534 = vmatpush3.bf16.msra.mxu1 %v5085_v34  ;;  %4516 = vmatprep.mubr.msk.f32.mxu1 %vm634_vm0, %v5598_v35  ;;  %v5099_v34 = vld [vmem:[%s6754_s1 + $0x90] sm:$0xff]  }
 0x157   : > { %4535 = vmatprep.subr.bf16.mxu1 %v5086_v38 }
 0x159   : > { %v5620_v41 = vpop.f32.mrb[12].mxu0  ;;  %4517 = vmatmul.mubr.msk.f32.gmra.mrb[10].mxu1 %vm634_vm0, %v5604_v37 }
 0x15a   : > { %6845 = vst [vmem:[#allocation30_spill] sm:$0xff] %v5620_v41  ;;  %4536 = vmatpush3.bf16.msra.mxu1 %v5086_v38  ;;  %v5624_v42 = vpop.f32.mrb[13].mxu0 }
 0x15b   : > { %6846 = vst [vmem:[#allocation31_spill] sm:$0xff] %v5624_v42  ;;  %v5626_v43 = vpop.f32.mrb[14].mxu0  ;;  %4519 = vmatprep.mubr.msk.f32.mxu1 %vm634_vm0, %v5624_v42  ;;  %4537 = vmatprep.subr.bf16.mxu1 %v5087_v40 }
 0x15c   : > { %6847 = vst [vmem:[#allocation32_spill] sm:$0xff] %v5626_v43  ;;  %v5633_v45 = vpop.f32.mrb[15].mxu0 }
 0x15d   : > { %6848 = vst [vmem:[#allocation33_spill] sm:$0xff] %v5633_v45  ;;  %4520 = vmatmul.mubr.msk.f32.gmra.mrb[12].mxu1 %vm634_vm0, %v5633_v45 }
 0x15e   : > { %4538 = vmatpush3.bf16.msra.mxu1 %v5087_v40  ;;  %4522 = vmatprep.mubr.msk.f32.mxu1 %vm634_vm0, %v5620_v41 }
 0x15f   : > { %4539 = vmatprep.subr.bf16.mxu1 %v5088_v44 }
 0x161   : > { %4523 = vmatmul.mubr.msk.f32.gmra.mrb[14].mxu1 %vm634_vm0, %v5626_v43 }
 0x162   : > { %4540 = vmatpush3.bf16.msra.mxu1 %v5088_v44  ;;  %4541 = vmatprep.mubr.bf16.mxu1 %v5089_v46  ;;  %v5100_v46 = vld [vmem:[%s6754_s1 + $0x98] sm:$0xff]  }
 0x163   : > { %4902 = vmatprep.subr.bf16.mxu1 %v5529_v10 }
 0x165   : > { %4542 = vmatmul.mubr.bf16.vlgmr.msra.gmra.mrb[16].mxu1 %v5090_v47 }
 0x166   : > { %4545 = vmatprep.mubr.bf16.mxu1 %v5091_v48  ;;  %4904 = vmatpush3.bf16.msra.mxu1 %v5529_v10  ;;  %v5101_v48 = vld [vmem:[%s6754_s1 + $0xa0] sm:$0xff]  }
 0x167   : > { %4906 = vmatprep.subr.bf16.mxu1 %v5537_v13 }
 0x16a   : > { %4908 = vmatpush3.bf16.msra.mxu1 %v5537_v13 }
 0x16b   : > { %4653 = vmatprep.subr.bf16.mxu1 %v5097_v60 }
 0x16d   : > { %4546 = vmatmul.mubr.bf16.gmra.mrb[20].mxu1 %v5092_v49 }
 0x16e   : > { %4549 = vmatprep.mubr.bf16.mxu1 %v5093_v50 }
 0x175   : > { %4550 = vmatmul.mubr.bf16.gmra.mrb[24].mxu1 %v5094_v51 }
 0x176   : > { %4553 = vmatprep.mubr.bf16.mxu1 %v5095_v52  ;;  %v5102_v52 = vld [vmem:[%s6754_s1 + $0xa8] sm:$0xff]  }
 0x17d   : > { %4554 = vmatmul.mubr.bf16.gmra.mrb[28].mxu1 %v5096_v53 }
 0x218   : > { %v5674_v0 = vpop.f32.mrb[0].mxu1 }
 0x219   : > { %v5676_v1 = vpop.f32.mrb[1].mxu1 }
 0x21c   : > { %v5678_v2 = vpop.f32.mrb[2].mxu1 }
 0x21d   : > { %v5680_v3 = vpop.f32.mrb[3].mxu1 }
 0x220   : > { %v5682_v4 = vpop.f32.mrb[4].mxu1 }
 0x221   : > { %v5684_v5 = vpop.f32.mrb[5].mxu1 }
 0x224   : > { %v5686_v6 = vpop.f32.mrb[6].mxu1 }
 0x225   : > { %v5688_v7 = vpop.f32.mrb[7].mxu1 }
 0x228   : > { %v5690_v8 = vpop.f32.mrb[8].mxu1 }
 0x229   : > { %v5692_v9 = vpop.f32.mrb[9].mxu1 }
 0x22c   : > { %v5694_v11 = vpop.f32.mrb[10].mxu1 }
 0x22d   : > { %v5696_v12 = vpop.f32.mrb[11].mxu1 }
 0x230   : > { %v5698_v14 = vpop.f32.mrb[12].mxu1 }
 0x231   : > { %v5700_v15 = vpop.f32.mrb[13].mxu1 }
 0x234   : > { %v5702_v16 = vpop.f32.mrb[14].mxu1 }
 0x235   : > { %6849 = vst [vmem:[#allocation34_spill] sm:$0xff] %v5702_v16  ;;  %v5704_v17 = vpop.f32.mrb[15].mxu1 }
 0x236   : > { %6850 = vst [vmem:[#allocation35_spill] sm:$0xff] %v5704_v17 }
 0x238   : > { %v5706_v18 = vpop.f32.mrb[16].mxu1 }
 0x239   : > { %6851 = vst [vmem:[#allocation36_spill] sm:$0xff] %v5706_v18  ;;  %v5708_v19 = vpop.f32.mrb[17].mxu1 }
 0x23a   : > { %6852 = vst [vmem:[#allocation37_spill] sm:$0xff] %v5708_v19  ;;  %v5710_v20 = vpop.f32.mrb[18].mxu1  ;;  %4565 = vmatprep.mubr.msk.f32.mxu0 %vm634_vm0, %v5708_v19  ;;  %4629 = vmatprep.mubr.msk.f32.mxu1 %vm634_vm0, %v5708_v19 }
 0x23b   : > { %6853 = vst [vmem:[#allocation38_spill] sm:$0xff] %v5710_v20  ;;  %v5725_v28 = vpop.f32.mrb[19].mxu1 }
 0x23c   : > { %6854 = vst [vmem:[#allocation39_spill] sm:$0xff] %v5725_v28  ;;  %4566 = vmatmul.mubr.msk.f32.vlgmr.msra.gmra.mrb[16].mxu0 %vm634_vm0, %v5725_v28  ;;  %4630 = vmatmul.mubr.msk.f32.vlgmr.msra.gmra.mrb[32].mxu1 %vm634_vm0, %v5725_v28 }
 0x23d   : > { %4654 = vmatpush3.bf16.msra.mxu1 %v5097_v60  ;;  %4568 = vmatprep.mubr.msk.f32.mxu0 %vm634_vm0, %v5706_v18  ;;  %v5105_v60 = vld [vmem:[%s5491_s15 + $0x80] sm:$0xff]  }
 0x23e   : > { %4632 = vmatprep.mubr.msk.f32.mxu1 %vm634_vm0, %v5706_v18  ;;  %4655 = vmatprep.subr.bf16.mxu1 %v5098_v21 }
 0x23f   : > { %4896 = vmatpush3.bf16.msra.mxu0 %v4893_v63  ;;  %v5108_v63 = vld [vmem:[%s5491_s15 + $0x98] sm:$0xff]  }
 0x240   : > { %v5738_v38 = vpop.f32.mrb[20].mxu1  ;;  %4569 = vmatmul.mubr.msk.f32.gmra.mrb[18].mxu0 %vm634_vm0, %v5710_v20  ;;  %4633 = vmatmul.mubr.msk.f32.gmra.mrb[34].mxu1 %vm634_vm0, %v5710_v20 }
 0x241   : > { %6855 = vst [vmem:[#allocation40_spill] sm:$0xff] %v5738_v38  ;;  %4656 = vmatpush3.bf16.msra.mxu1 %v5098_v21  ;;  %v5744_v40 = vpop.f32.mrb[21].mxu1  ;;  %4898 = vmatprep.subr.bf16.mxu0 %v4897_v32  ;;  %v5109_v21 = vld [vmem:[%s5491_s15 + $0xa0] sm:$0xff]  }
 0x242   : > { %6856 = vst [vmem:[#allocation41_spill] sm:$0xff] %v5744_v40  ;;  %v5746_v44 = vpop.f32.mrb[22].mxu1  ;;  %4571 = vmatprep.mubr.msk.f32.mxu0 %vm634_vm0, %v5744_v40  ;;  %4635 = vmatprep.mubr.msk.f32.mxu1 %vm634_vm0, %v5744_v40 }
 0x243   : > { %6857 = vst [vmem:[#allocation42_spill] sm:$0xff] %v5746_v44  ;;  %v5755_v47 = vpop.f32.mrb[23].mxu1  ;;  %4657 = vmatprep.subr.bf16.mxu1 %v5099_v34  ;;  %4900 = vmatpush3.bf16.msra.mxu0 %v4897_v32  ;;  %v4107_v32 = vld [vmem:[%s6755_s2 + $0x48] sm:$0xff] }
 0x244   : > { %6858 = vst [vmem:[#allocation43_spill] sm:$0xff] %v5755_v47  ;;  %4572 = vmatmul.mubr.msk.f32.gmra.mrb[20].mxu0 %vm634_vm0, %v5755_v47  ;;  %4636 = vmatmul.mubr.msk.f32.gmra.mrb[36].mxu1 %vm634_vm0, %v5755_v47 }
 0x245   : > { %4658 = vmatpush3.bf16.msra.mxu1 %v5099_v34  ;;  %4574 = vmatprep.mubr.msk.f32.mxu0 %vm634_vm0, %v5738_v38  ;;  %v4909_v34 = vpack.c.bf16 %v4107_v32, %v4106_v26 }
 0x246   : > { %4638 = vmatprep.mubr.msk.f32.mxu1 %vm634_vm0, %v5738_v38  ;;  %4659 = vmatprep.subr.bf16.mxu1 %v5100_v46 }
 0x247   : > { %4910 = vmatprep.subr.bf16.mxu0 %v4909_v34 }
 0x248   : > { %v5768_v49 = vpop.f32.mrb[24].mxu1  ;;  %4575 = vmatmul.mubr.msk.f32.gmra.mrb[22].mxu0 %vm634_vm0, %v5746_v44  ;;  %4639 = vmatmul.mubr.msk.f32.gmra.mrb[38].mxu1 %vm634_vm0, %v5746_v44 }
 0x249   : > { %6859 = vst [vmem:[#allocation44_spill] sm:$0xff] %v5768_v49  ;;  %4660 = vmatpush3.bf16.msra.mxu1 %v5100_v46  ;;  %v5774_v50 = vpop.f32.mrb[25].mxu1  ;;  %v4108_v46 = vld [vmem:[%s6755_s2 + $0x50] sm:$0xff] }
 0x24a   : > { %6860 = vst [vmem:[#allocation45_spill] sm:$0xff] %v5774_v50  ;;  %v5776_v51 = vpop.f32.mrb[26].mxu1  ;;  %4577 = vmatprep.mubr.msk.f32.mxu0 %vm634_vm0, %v5774_v50  ;;  %4641 = vmatprep.mubr.msk.f32.mxu1 %vm634_vm0, %v5774_v50 }
 0x24b   : > { %6861 = vst [vmem:[#allocation46_spill] sm:$0xff] %v5776_v51  ;;  %v5785_v53 = vpop.f32.mrb[27].mxu1  ;;  %4661 = vmatprep.subr.bf16.mxu1 %v5101_v48 }
 0x24c   : > { %6862 = vst [vmem:[#allocation47_spill] sm:$0xff] %v5785_v53  ;;  %4578 = vmatmul.mubr.msk.f32.gmra.mrb[24].mxu0 %vm634_vm0, %v5785_v53  ;;  %4642 = vmatmul.mubr.msk.f32.gmra.mrb[40].mxu1 %vm634_vm0, %v5785_v53 }
 0x24d   : > { %4662 = vmatpush3.bf16.msra.mxu1 %v5101_v48  ;;  %4580 = vmatprep.mubr.msk.f32.mxu0 %vm634_vm0, %v5768_v49  ;;  %v4109_v48 = vld [vmem:[%s6755_s2 + $0x58] sm:$0xff] }
 0x24e   : > { %4644 = vmatprep.mubr.msk.f32.mxu1 %vm634_vm0, %v5768_v49  ;;  %4663 = vmatprep.subr.bf16.mxu1 %v5102_v52 }
 0x250   : > { %v5798_v55 = vpop.f32.mrb[28].mxu1  ;;  %4581 = vmatmul.mubr.msk.f32.gmra.mrb[26].mxu0 %vm634_vm0, %v5776_v51  ;;  %4645 = vmatmul.mubr.msk.f32.gmra.mrb[42].mxu1 %vm634_vm0, %v5776_v51 }
 0x251   : > { %6863 = vst [vmem:[#allocation48_spill] sm:$0xff] %v5798_v55  ;;  %4664 = vmatpush3.bf16.msra.mxu1 %v5102_v52  ;;  %v5804_v56 = vpop.f32.mrb[29].mxu1  ;;  %v4913_v52 = vpack.c.bf16 %v4109_v48, %v4108_v46 }
 0x252   : > { %6864 = vst [vmem:[#allocation49_spill] sm:$0xff] %v5804_v56  ;;  %v5806_v57 = vpop.f32.mrb[30].mxu1  ;;  %4583 = vmatprep.mubr.msk.f32.mxu0 %vm634_vm0, %v5804_v56  ;;  %4647 = vmatprep.mubr.msk.f32.mxu1 %vm634_vm0, %v5804_v56 }
 0x253   : > { %6865 = vst [vmem:[#allocation50_spill] sm:$0xff] %v5806_v57  ;;  %v5815_v59 = vpop.f32.mrb[31].mxu1  ;;  %4665 = vmatprep.subr.bf16.mxu1 %v5103_v54 }
 0x254   : > { %6866 = vst [vmem:[#allocation51_spill] sm:$0xff] %v5815_v59  ;;  %4584 = vmatmul.mubr.msk.f32.gmra.mrb[28].mxu0 %vm634_vm0, %v5815_v59  ;;  %4648 = vmatmul.mubr.msk.f32.gmra.mrb[44].mxu1 %vm634_vm0, %v5815_v59 }
 0x255   : > { %4666 = vmatpush3.bf16.msra.mxu1 %v5103_v54  ;;  %4586 = vmatprep.mubr.msk.f32.mxu0 %vm634_vm0, %v5798_v55  ;;  %v2178_v54 = vld [vmem:[%s6756_s3] sm:$0xff] }
 0x256   : > { %4650 = vmatprep.mubr.msk.f32.mxu1 %vm634_vm0, %v5798_v55  ;;  %4667 = vmatprep.subr.bf16.mxu1 %v5104_v58 }
 0x258   : > { %4587 = vmatmul.mubr.msk.f32.gmra.mrb[30].mxu0 %vm634_vm0, %v5806_v57  ;;  %4651 = vmatmul.mubr.msk.f32.gmra.mrb[46].mxu1 %vm634_vm0, %v5806_v57  ;;  %v2181_v57 = vld [vmem:[%s6756_s3 + $0x18] sm:$0xff] }
 0x259   : > { %4668 = vmatpush3.bf16.msra.mxu1 %v5104_v58  ;;  %4597 = vmatprep.mubr.msk.f32.mxu0 %vm634_vm0, %v5558_v24  ;;  %v2179_v58 = vld [vmem:[%s6756_s3 + $0x8] sm:$0xff] }
 0x25a   : > { %4669 = vmatprep.mubr.bf16.mxu1 %v5105_v60  ;;  %4918 = vmatprep.subr.bf16.mxu1 %v5529_v10  ;;  %v4925_v60 = vpack.c.bf16 %v2179_v58, %v2178_v54 }
 0x25c   : > { %4598 = vmatmul.mubr.msk.f32.vlgmr.msra.gmra.mrb[16].mxu0 %vm634_vm0, %v5567_v27  ;;  %4670 = vmatmul.mubr.bf16.vlgmr.msra.gmra.mrb[48].mxu1 %v5106_v61 }
 0x25d   : > { %4600 = vmatprep.mubr.msk.f32.mxu0 %vm634_vm0, %v5556_v23  ;;  %4673 = vmatprep.mubr.bf16.mxu1 %v5107_v62 }
 0x25e   : > { %4920 = vmatpush3.bf16.msra.mxu1 %v5529_v10  ;;  %v5110_v10 = vld [vmem:[%s5491_s15 + $0xa8] sm:$0xff]   ;;  %4912 = vmatpush3.bf16.msra.mxu0 %v4909_v34 }
 0x25f   : > { %4922 = vmatprep.subr.bf16.mxu1 %v5537_v13  ;;  %4914 = vmatprep.subr.bf16.mxu0 %v4913_v52 }
 0x260   : > { %4601 = vmatmul.mubr.msk.f32.gmra.mrb[18].mxu0 %vm634_vm0, %v5560_v25 }
 0x261   : > { %4603 = vmatprep.mubr.msk.f32.mxu0 %vm634_vm0, %v5580_v30 }
 0x262   : > { %4924 = vmatpush3.bf16.msra.mxu1 %v5537_v13  ;;  %v5112_v13 = vld [vmem:[%s5491_s15 + $0xb8] sm:$0xff]   ;;  %4916 = vmatpush3.bf16.msra.mxu0 %v4913_v52  ;;  %s5256_s15 = scalar_lea.vmem %s6707_s14, 2048 }
 0x263   : > { %4926 = vmatprep.subr.bf16.mxu0 %v4925_v60  ;;  %p5257_p4 = scmp.ne.s32.totalorder %s6707_s14, %s5256_s15  ;;  %p5264_p0 = scmp.lt.s32.totalorder %s5262_s23, %s5256_s15 }
 0x264   : > { %4604 = vmatmul.mubr.msk.f32.gmra.mrb[20].mxu0 %vm634_vm0, %v5589_v33  ;;  %4674 = vmatmul.mubr.bf16.gmra.mrb[52].mxu1 %v5108_v63 }
 0x265   : > { %4606 = vmatprep.mubr.msk.f32.mxu0 %vm634_vm0, %v5576_v29  ;;  %4677 = vmatprep.mubr.bf16.mxu1 %v5109_v21  ;;  %p5258_p12 = pnand %p5257_p4, %p6951_p5  ;;  %p5265_p2 = por %p5264_p0, %p5263_p1 }
 0x267   : > { %p5259_p13 = pneg %p5258_p12 }
 0x268   : > { %4607 = vmatmul.mubr.msk.f32.gmra.mrb[22].mxu0 %vm634_vm0, %v5582_v31 }
 0x269   : > { %4609 = vmatprep.mubr.msk.f32.mxu0 %vm634_vm0, %v5602_v36  ;;  %p5266_p3 = pnand %p5265_p2, %p5259_p13 }
 0x26c   : > { %4610 = vmatmul.mubr.msk.f32.gmra.mrb[24].mxu0 %vm634_vm0, %v5611_v39  ;;  %4678 = vmatmul.mubr.bf16.gmra.mrb[56].mxu1 %v5110_v10 }
 0x26d   : > { %4612 = vmatprep.mubr.msk.f32.mxu0 %vm634_vm0, %v5598_v35  ;;  %4681 = vmatprep.mubr.bf16.mxu1 %v5111_v22 }
 0x270   : > { %4613 = vmatmul.mubr.msk.f32.gmra.mrb[26].mxu0 %vm634_vm0, %v5604_v37 }
 0x271   : > { %4615 = vmatprep.mubr.msk.f32.mxu0 %vm634_vm0, %v5624_v42 }
 0x274   : > { %4616 = vmatmul.mubr.msk.f32.gmra.mrb[28].mxu0 %vm634_vm0, %v5633_v45  ;;  %4682 = vmatmul.mubr.bf16.gmra.mrb[60].mxu1 %v5112_v13 }
 0x275   : > { %4618 = vmatprep.mubr.msk.f32.mxu0 %vm634_vm0, %v5620_v41 }
 0x278   : > { %4619 = vmatmul.mubr.msk.f32.gmra.mrb[30].mxu0 %vm634_vm0, %v5626_v43  ;;  %v2180_v43 = vld [vmem:[%s6756_s3 + $0x10] sm:$0xff] }
 0x279   : > { %v4929_v59 = vpack.c.bf16 %v2181_v57, %v2180_v43 }
 0x30f   : > { %v5891_v61 = vpop.f32.mrb[32].mxu1 }
 0x310   : > { %v5893_v62 = vpop.f32.mrb[33].mxu1 }
 0x313   : > { %v5895_v63 = vpop.f32.mrb[34].mxu1 }
 0x314   : > { %v5897_v21 = vpop.f32.mrb[35].mxu1 }
 0x317   : > { %v5899_v10 = vpop.f32.mrb[36].mxu1 }
 0x318   : > { %v5901_v22 = vpop.f32.mrb[37].mxu1 }
 0x31b   : > { %v5903_v13 = vpop.f32.mrb[38].mxu1 }
 0x31c   : > { %v5905_v26 = vpop.f32.mrb[39].mxu1 }
 0x31f   : > { %v5907_v32 = vpop.f32.mrb[40].mxu1 }
 0x320   : > { %v5909_v34 = vpop.f32.mrb[41].mxu1 }
 0x323   : > { %v5911_v46 = vpop.f32.mrb[42].mxu1 }
 0x324   : > { %v5913_v48 = vpop.f32.mrb[43].mxu1 }
 0x327   : > { %v5915_v52 = vpop.f32.mrb[44].mxu1 }
 0x328   : > { %v5917_v54 = vpop.f32.mrb[45].mxu1 }
 0x32b   : > { %v5919_v58 = vpop.f32.mrb[46].mxu1 }
 0x32c   : > { %6867 = vst [vmem:[#allocation52_spill] sm:$0xff] %v5919_v58  ;;  %v5921_v41 = vpop.f32.mrb[47].mxu1 }
 0x32d   : > { %6868 = vst [vmem:[#allocation53_spill] sm:$0xff] %v5921_v41 }
 0x32f   : > { %v5923_v55 = vpop.f32.mrb[48].mxu1 }
 0x330   : > { %6869 = vst [vmem:[#allocation54_spill] sm:$0xff] %v5923_v55  ;;  %v5931_v56 = vpop.f32.mrb[49].mxu1 }
 0x331   : > { %6870 = vst [vmem:[#allocation55_spill] sm:$0xff] %v5931_v56  ;;  %v5933_v42 = vpop.f32.mrb[50].mxu1  ;;  %4693 = vmatprep.mubr.msk.f32.mxu0 %vm634_vm0, %v5931_v56  ;;  %4725 = vmatprep.mubr.msk.f32.mxu1 %vm634_vm0, %v5931_v56 }
 0x332   : > { %6871 = vst [vmem:[#allocation56_spill] sm:$0xff] %v5933_v42  ;;  %v5939_v45 = vpop.f32.mrb[51].mxu1 }
 0x333   : > { %6872 = vst [vmem:[#allocation57_spill] sm:$0xff] %v5939_v45  ;;  %4694 = vmatmul.mubr.msk.f32.vlgmr.msra.gmra.mrb[16].mxu0 %vm634_vm0, %v5939_v45  ;;  %4726 = vmatmul.mubr.msk.f32.vlgmr.msra.gmra.mrb[64].mxu1 %vm634_vm0, %v5939_v45 }
 0x334   : > { %4696 = vmatprep.mubr.msk.f32.mxu0 %vm634_vm0, %v5923_v55  ;;  %4728 = vmatprep.mubr.msk.f32.mxu1 %vm634_vm0, %v5923_v55 }
 0x335   : > { %4928 = vmatpush3.bf16.msra.mxu0 %v4925_v60 }
 0x336   : > { %4930 = vmatprep.subr.bf16.mxu0 %v4929_v59 }
 0x337   : > { %v5949_v49 = vpop.f32.mrb[52].mxu1  ;;  %4697 = vmatmul.mubr.msk.f32.gmra.mrb[18].mxu0 %vm634_vm0, %v5933_v42  ;;  %4729 = vmatmul.mubr.msk.f32.gmra.mrb[66].mxu1 %vm634_vm0, %v5933_v42 }
 0x338   : > { %6873 = vst [vmem:[#allocation58_spill] sm:$0xff] %v5949_v49  ;;  %v5955_v43 = vpop.f32.mrb[53].mxu1 }
 0x339   : > { %6874 = vst [vmem:[#allocation59_spill] sm:$0xff] %v5955_v43  ;;  %v5957_v57 = vpop.f32.mrb[54].mxu1  ;;  %4699 = vmatprep.mubr.msk.f32.mxu0 %vm634_vm0, %v5955_v43  ;;  %4731 = vmatprep.mubr.msk.f32.mxu1 %vm634_vm0, %v5955_v43 }
 0x33a   : > { %6875 = vst [vmem:[#allocation60_spill] sm:$0xff] %v5957_v57  ;;  %v5963_v60 = vpop.f32.mrb[55].mxu1  ;;  %4932 = vmatpush3.bf16.msra.mxu0 %v4929_v59 }
 0x33b   : > { %6876 = vst [vmem:[#allocation61_spill] sm:$0xff] %v5963_v60  ;;  %4700 = vmatmul.mubr.msk.f32.gmra.mrb[20].mxu0 %vm634_vm0, %v5963_v60  ;;  %4732 = vmatmul.mubr.msk.f32.gmra.mrb[68].mxu1 %vm634_vm0, %v5963_v60 }
 0x33c   : > { %4702 = vmatprep.mubr.msk.f32.mxu0 %vm634_vm0, %v5949_v49  ;;  %4734 = vmatprep.mubr.msk.f32.mxu1 %vm634_vm0, %v5949_v49 }
 0x33f   : > { %v5973_v35 = vpop.f32.mrb[56].mxu1  ;;  %4703 = vmatmul.mubr.msk.f32.gmra.mrb[22].mxu0 %vm634_vm0, %v5957_v57  ;;  %4735 = vmatmul.mubr.msk.f32.gmra.mrb[70].mxu1 %vm634_vm0, %v5957_v57 }
 0x340   : > { %6877 = vst [vmem:[#allocation62_spill] sm:$0xff] %v5973_v35  ;;  %v5979_v59 = vpop.f32.mrb[57].mxu1 }
 0x341   : > { %6878 = vst [vmem:[#allocation63_spill] sm:$0xff] %v5979_v59  ;;  %v5981_v37 = vpop.f32.mrb[58].mxu1  ;;  %4705 = vmatprep.mubr.msk.f32.mxu0 %vm634_vm0, %v5979_v59  ;;  %4737 = vmatprep.mubr.msk.f32.mxu1 %vm634_vm0, %v5979_v59 }
 0x342   : > { %6879 = vst [vmem:[#allocation64_spill] sm:$0xff] %v5981_v37  ;;  %v5987_v51 = vpop.f32.mrb[59].mxu1 }
 0x343   : > { %6880 = vst [vmem:[#allocation65_spill] sm:$0xff] %v5987_v51  ;;  %4706 = vmatmul.mubr.msk.f32.gmra.mrb[24].mxu0 %vm634_vm0, %v5987_v51  ;;  %4738 = vmatmul.mubr.msk.f32.gmra.mrb[72].mxu1 %vm634_vm0, %v5987_v51 }
 0x344   : > { %4708 = vmatprep.mubr.msk.f32.mxu0 %vm634_vm0, %v5973_v35  ;;  %4740 = vmatprep.mubr.msk.f32.mxu1 %vm634_vm0, %v5973_v35  ;;  %v399_v35 = vld [vmem:[%s6757_s4 + $0x10] sm:$0xff] }
 0x347   : > { %v5997_v50 = vpop.f32.mrb[60].mxu1  ;;  %4709 = vmatmul.mubr.msk.f32.gmra.mrb[26].mxu0 %vm634_vm0, %v5981_v37  ;;  %4741 = vmatmul.mubr.msk.f32.gmra.mrb[74].mxu1 %vm634_vm0, %v5981_v37 }
 0x348   : > { %6881 = vst [vmem:[#allocation66_spill] sm:$0xff] %v5997_v50  ;;  %v6003_v59 = vpop.f32.mrb[61].mxu1 }
 0x349   : > { %6882 = vst [vmem:[#allocation67_spill] sm:$0xff] %v6003_v59  ;;  %v6005_v36 = vpop.f32.mrb[62].mxu1  ;;  %4711 = vmatprep.mubr.msk.f32.mxu0 %vm634_vm0, %v6003_v59  ;;  %4743 = vmatprep.mubr.msk.f32.mxu1 %vm634_vm0, %v6003_v59  ;;  %v397_v59 = vld [vmem:[%s6757_s4] sm:$0xff] }
 0x34a   : > { %6883 = vst [vmem:[#allocation68_spill] sm:$0xff] %v6005_v36  ;;  %v6011_v51 = vpop.f32.mrb[63].mxu1 }
 0x34b   : > { %6884 = vst [vmem:[#allocation69_spill] sm:$0xff] %v6011_v51  ;;  %4712 = vmatmul.mubr.msk.f32.gmra.mrb[28].mxu0 %vm634_vm0, %v6011_v51  ;;  %4744 = vmatmul.mubr.msk.f32.gmra.mrb[76].mxu1 %vm634_vm0, %v6011_v51  ;;  %v398_v51 = vld [vmem:[%s6757_s4 + $0x8] sm:$0xff] }
 0x34c   : > { %4714 = vmatprep.mubr.msk.f32.mxu0 %vm634_vm0, %v5997_v50  ;;  %4746 = vmatprep.mubr.msk.f32.mxu1 %vm634_vm0, %v5997_v50  ;;  %v4933_v37 = vpack.c.bf16 %v398_v51, %v397_v59  ;;  %v400_v50 = vld [vmem:[%s6757_s4 + $0x18] sm:$0xff] }
 0x34d   : > { %v4937_v39 = vpack.c.bf16 %v400_v50, %v399_v35 }
 0x34e   : > { %4934 = vmatprep.subr.bf16.mxu1 %v4933_v37 }
 0x34f   : > { %4715 = vmatmul.mubr.msk.f32.gmra.mrb[30].mxu0 %vm634_vm0, %v6005_v36  ;;  %4747 = vmatmul.mubr.msk.f32.gmra.mrb[78].mxu1 %vm634_vm0, %v6005_v36  ;;  %v6037_v36 = vstv %s3923_s20 }
 0x350   : > { %4936 = vmatpush3.bf16.msra.mxu1 %v4933_v37 }
 0x351   : > { %4938 = vmatprep.subr.bf16.mxu1 %v4937_v39 }
 0x354   : > { %4940 = vmatpush3.bf16.msra.mxu1 %v4937_v39 }
 0x406   : > { %v4695_v53 = vpop.f32.mrb[16].mxu0  ;;  %v6039_v49 = vpop.f32.mrb[64].mxu1 }
 0x407   : > { %v2147_v38 = vmul.f32 %v4695_v53, %v6037_v36  ;;  %v1889_v29 = vpop.f32.mrb[17].mxu0  ;;  %v6042_v57 = vpop.f32.mrb[65].mxu1  ;;  %vm2130_vm1 = vcmp.ge.f32.partialorder %v4695_v53, 0.0 }
 0x408   : > { %vm2129_vm2 = vcmp.ge.f32.partialorder %v1889_v29, 0.0  ;;  %v2146_v51 = vmul.f32 %v6037_v36, %v1889_v29 }
 0x409   : > { %v2163_v39 = vsel %vm2130_vm1, %v4695_v53, %v2147_v38 }
 0x40a   : > { %v4698_v35 = vpop.f32.mrb[18].mxu0  ;;  %v6045_v50 = vpop.f32.mrb[66].mxu1  ;;  %v2162_v37 = vsel %vm2129_vm2, %v1889_v29, %v2146_v51 }
 0x40b   : > { %v2149_v59 = vmul.f32 %v4698_v35, %v6037_v36  ;;  %v1899_v31 = vpop.f32.mrb[19].mxu0  ;;  %v6048_v44 = vpop.f32.mrb[67].mxu1  ;;  %4757 = vmatprep.mubr.msk.f32.mxu0 %vm634_vm0, %v2162_v37  ;;  %vm2132_vm3 = vcmp.ge.f32.partialorder %v4698_v35, 0.0 }
 0x40c   : > { %vm2131_vm4 = vcmp.ge.f32.partialorder %v1899_v31, 0.0  ;;  %v2148_v43 = vmul.f32 %v6037_v36, %v1899_v31  ;;  %4758 = vmatmul.mubr.msk.f32.vlgmr.msra.gmra.mrb[32].mxu0 %vm634_vm0, %v2163_v39 }
 0x40d   : > { %v2165_v53 = vsel %vm2132_vm3, %v4698_v35, %v2149_v59 }
 0x40e   : > { %v4701_v40 = vpop.f32.mrb[20].mxu0  ;;  %v2164_v30 = vsel %vm2131_vm4, %v1899_v31, %v2148_v43  ;;  %v6053_v60 = vpop.f32.mrb[68].mxu1 }
 0x40f   : > { %v2151_v29 = vmul.f32 %v4701_v40, %v6037_v36  ;;  %v1909_v38 = vpop.f32.mrb[21].mxu0  ;;  %4760 = vmatprep.mubr.msk.f32.mxu0 %vm634_vm0, %v2164_v30  ;;  %v6057_v51 = vpop.f32.mrb[69].mxu1  ;;  %vm2134_vm5 = vcmp.ge.f32.partialorder %v4701_v40, 0.0 }
 0x410   : > { %vm2133_vm6 = vcmp.ge.f32.partialorder %v1909_v38, 0.0  ;;  %v2150_v37 = vmul.f32 %v6037_v36, %v1909_v38  ;;  %4761 = vmatmul.mubr.msk.f32.gmra.mrb[34].mxu0 %vm634_vm0, %v2165_v53 }
 0x411   : > { %v2167_v55 = vsel %vm2134_vm5, %v4701_v40, %v2151_v29 }
 0x412   : > { %v4704_v33 = vpop.f32.mrb[22].mxu0  ;;  %v2166_v39 = vsel %vm2133_vm6, %v1909_v38, %v2150_v37  ;;  %v6061_v47 = vpop.f32.mrb[70].mxu1 }
 0x413   : > { %v2153_v31 = vmul.f32 %v4704_v33, %v6037_v36  ;;  %v1919_v43 = vpop.f32.mrb[23].mxu0  ;;  %4763 = vmatprep.mubr.msk.f32.mxu0 %vm634_vm0, %v2166_v39  ;;  %v6065_v30 = vpop.f32.mrb[71].mxu1  ;;  %vm2136_vm7 = vcmp.ge.f32.partialorder %v4704_v33, 0.0 }
 0x414   : > { %vm2135_vm8 = vcmp.ge.f32.partialorder %v1919_v43, 0.0  ;;  %v2152_v35 = vmul.f32 %v6037_v36, %v1919_v43  ;;  %4764 = vmatmul.mubr.msk.f32.gmra.mrb[36].mxu0 %vm634_vm0, %v2167_v55 }
 0x415   : > { %v2169_v23 = vsel %vm2136_vm7, %v4704_v33, %v2153_v31 }
 0x416   : > { %v4707_v59 = vpop.f32.mrb[24].mxu0  ;;  %v2168_v53 = vsel %vm2135_vm8, %v1919_v43, %v2152_v35  ;;  %v6069_v18 = vpop.f32.mrb[72].mxu1 }
 0x417   : > { %v2155_v38 = vmul.f32 %v4707_v59, %v6037_v36  ;;  %v1929_v37 = vpop.f32.mrb[25].mxu0  ;;  %4766 = vmatprep.mubr.msk.f32.mxu0 %vm634_vm0, %v2168_v53  ;;  %v6073_v39 = vpop.f32.mrb[73].mxu1  ;;  %vm2138_vm9 = vcmp.ge.f32.partialorder %v4707_v59, 0.0 }
 0x418   : > { %vm2137_vm10 = vcmp.ge.f32.partialorder %v1929_v37, 0.0  ;;  %v2154_v40 = vmul.f32 %v6037_v36, %v1929_v37  ;;  %4767 = vmatmul.mubr.msk.f32.gmra.mrb[38].mxu0 %vm634_vm0, %v2169_v23 }
 0x419   : > { %v2171_v25 = vsel %vm2138_vm9, %v4707_v59, %v2155_v38 }
 0x41a   : > { %v4710_v29 = vpop.f32.mrb[26].mxu0  ;;  %v2170_v55 = vsel %vm2137_vm10, %v1929_v37, %v2154_v40  ;;  %v6077_v42 = vpop.f32.mrb[74].mxu1 }
 0x41b   : > { %v2157_v43 = vmul.f32 %v4710_v29, %v6037_v36  ;;  %v1939_v35 = vpop.f32.mrb[27].mxu0  ;;  %4769 = vmatprep.mubr.msk.f32.mxu0 %vm634_vm0, %v2170_v55  ;;  %v6081_v53 = vpop.f32.mrb[75].mxu1  ;;  %vm2140_vm11 = vcmp.ge.f32.partialorder %v4710_v29, 0.0 }
 0x41c   : > { %vm2139_vm12 = vcmp.ge.f32.partialorder %v1939_v35, 0.0  ;;  %v2156_v33 = vmul.f32 %v6037_v36, %v1939_v35  ;;  %4770 = vmatmul.mubr.msk.f32.gmra.mrb[40].mxu0 %vm634_vm0, %v2171_v25 }
 0x41d   : > { %v2173_v56 = vsel %vm2140_vm11, %v4710_v29, %v2157_v43 }
 0x41e   : > { %v4713_v31 = vpop.f32.mrb[28].mxu0  ;;  %v2172_v23 = vsel %vm2139_vm12, %v1939_v35, %v2156_v33  ;;  %v6085_v20 = vpop.f32.mrb[76].mxu1 }
 0x41f   : > { %v2159_v37 = vmul.f32 %v4713_v31, %v6037_v36  ;;  %v1949_v40 = vpop.f32.mrb[29].mxu0  ;;  %4772 = vmatprep.mubr.msk.f32.mxu0 %vm634_vm0, %v2172_v23  ;;  %v6089_v55 = vpop.f32.mrb[77].mxu1  ;;  %vm2142_vm13 = vcmp.ge.f32.partialorder %v4713_v31, 0.0 }
 0x420   : > { %6885 = vst [vmem:[#allocation70_spill] sm:$0xff] %v6089_v55  ;;  %vm2141_vm14 = vcmp.ge.f32.partialorder %v1949_v40, 0.0  ;;  %v2158_v59 = vmul.f32 %v6037_v36, %v1949_v40  ;;  %4773 = vmatmul.mubr.msk.f32.gmra.mrb[42].mxu0 %vm634_vm0, %v2173_v56 }
 0x421   : > { %v2175_v19 = vsel %vm2142_vm13, %v4713_v31, %v2159_v37 }
 0x422   : > { %v4716_v38 = vpop.f32.mrb[30].mxu0  ;;  %v2174_v25 = vsel %vm2141_vm14, %v1949_v40, %v2158_v59  ;;  %v6093_v45 = vpop.f32.mrb[78].mxu1  ;;  %v6103_v40 = vstv %s393_s26 }
 0x423   : > { %6886 = vst [vmem:[#allocation71_spill] sm:$0xff] %v6093_v45  ;;  %v2161_v35 = vmul.f32 %v4716_v38, %v6037_v36  ;;  %v1959_v33 = vpop.f32.mrb[31].mxu0  ;;  %4775 = vmatprep.mubr.msk.f32.mxu0 %vm634_vm0, %v2174_v25  ;;  %v6097_v23 = vpop.f32.mrb[79].mxu1  ;;  %vm2144_vm15 = vcmp.ge.f32.partialorder %v4716_v38, 0.0 }
 0x424   : > { %6887 = vst [vmem:[#allocation72_spill] sm:$0xff] %v6097_v23  ;;  %vm2143_vm1 = vcmp.ge.f32.partialorder %v1959_v33, 0.0  ;;  %v2160_v29 = vmul.f32 %v6037_v36, %v1959_v33  ;;  %4776 = vmatmul.mubr.msk.f32.gmra.mrb[44].mxu0 %vm634_vm0, %v2175_v19 }
 0x425   : > { %v2177_v56 = vsel %vm2144_vm15, %v4716_v38, %v2161_v35 }
 0x426   : > { %v2176_v43 = vsel %vm2143_vm1, %v1959_v33, %v2160_v29 }
 0x427   : > { %4778 = vmatprep.mubr.msk.f32.mxu0 %vm634_vm0, %v2176_v43 }
 0x428   : > { %4779 = vmatmul.mubr.msk.f32.gmra.mrb[46].mxu0 %vm634_vm0, %v2177_v56 }
 0x4df   : > { %v4759_v59 = vpop.f32.mrb[32].mxu0 }
 0x4e0   : > { %v2393_v31 = vmul.f32 %v4759_v59, %v6103_v40  ;;  %v2296_v37 = vpop.f32.mrb[33].mxu0  ;;  %vm2376_vm2 = vcmp.ge.f32.partialorder %v4759_v59, 0.0 }
 0x4e1   : > { %vm2375_vm3 = vcmp.ge.f32.partialorder %v2296_v37, 0.0  ;;  %v2392_v25 = vmul.f32 %v6103_v40, %v2296_v37 }
 0x4e2   : > { %v2409_v19 = vsel %vm2376_vm2, %v4759_v59, %v2393_v31 }
 0x4e3   : > { %v4762_v36 = vpop.f32.mrb[34].mxu0  ;;  %v2408_v28 = vsel %vm2375_vm3, %v2296_v37, %v2392_v25 }
 0x4e4   : > { %v2395_v33 = vmul.f32 %v4762_v36, %v6103_v40  ;;  %v2306_v29 = vpop.f32.mrb[35].mxu0  ;;  %4789 = vmatprep.mubr.msk.f32.mxu1 %vm634_vm0, %v2408_v28  ;;  %vm2378_vm4 = vcmp.ge.f32.partialorder %v4762_v36, 0.0 }
 0x4e5   : > { %vm2377_vm5 = vcmp.ge.f32.partialorder %v2306_v29, 0.0  ;;  %v2394_v38 = vmul.f32 %v6103_v40, %v2306_v29  ;;  %4790 = vmatmul.mubr.msk.f32.vlgmr.msra.gmra.mrb[80].mxu1 %vm634_vm0, %v2409_v19 }
 0x4e6   : > { %v2411_v37 = vsel %vm2378_vm4, %v4762_v36, %v2395_v33 }
 0x4e7   : > { %v4765_v35 = vpop.f32.mrb[36].mxu0  ;;  %v2410_v43 = vsel %vm2377_vm5, %v2306_v29, %v2394_v38 }
 0x4e8   : > { %v2397_v56 = vmul.f32 %v4765_v35, %v6103_v40  ;;  %v2316_v24 = vpop.f32.mrb[37].mxu0  ;;  %4792 = vmatprep.mubr.msk.f32.mxu1 %vm634_vm0, %v2410_v43  ;;  %vm2380_vm6 = vcmp.ge.f32.partialorder %v4765_v35, 0.0 }
 0x4e9   : > { %vm2379_vm7 = vcmp.ge.f32.partialorder %v2316_v24, 0.0  ;;  %v2396_v59 = vmul.f32 %v6103_v40, %v2316_v24  ;;  %4793 = vmatmul.mubr.msk.f32.gmra.mrb[82].mxu1 %vm634_vm0, %v2411_v37 }
 0x4ea   : > { %v2413_v19 = vsel %vm2380_vm6, %v4765_v35, %v2397_v56 }
 0x4eb   : > { %v4768_v28 = vpop.f32.mrb[38].mxu0  ;;  %v2412_v31 = vsel %vm2379_vm7, %v2316_v24, %v2396_v59 }
 0x4ec   : > { %v2399_v25 = vmul.f32 %v4768_v28, %v6103_v40  ;;  %v2326_v27 = vpop.f32.mrb[39].mxu0  ;;  %4795 = vmatprep.mubr.msk.f32.mxu1 %vm634_vm0, %v2412_v31  ;;  %vm2382_vm8 = vcmp.ge.f32.partialorder %v4768_v28, 0.0 }
 0x4ed   : > { %vm2381_vm9 = vcmp.ge.f32.partialorder %v2326_v27, 0.0  ;;  %v2398_v29 = vmul.f32 %v6103_v40, %v2326_v27  ;;  %4796 = vmatmul.mubr.msk.f32.gmra.mrb[84].mxu1 %vm634_vm0, %v2413_v19 }
 0x4ee   : > { %v2415_v24 = vsel %vm2382_vm8, %v4768_v28, %v2399_v25 }
 0x4ef   : > { %v4771_v36 = vpop.f32.mrb[40].mxu0  ;;  %v2414_v33 = vsel %vm2381_vm9, %v2326_v27, %v2398_v29 }
 0x4f0   : > { %v2401_v38 = vmul.f32 %v4771_v36, %v6103_v40  ;;  %v2336_v43 = vpop.f32.mrb[41].mxu0  ;;  %4798 = vmatprep.mubr.msk.f32.mxu1 %vm634_vm0, %v2414_v33  ;;  %vm2384_vm10 = vcmp.ge.f32.partialorder %v4771_v36, 0.0 }
 0x4f1   : > { %vm2383_vm11 = vcmp.ge.f32.partialorder %v2336_v43, 0.0  ;;  %v2400_v37 = vmul.f32 %v6103_v40, %v2336_v43  ;;  %4799 = vmatmul.mubr.msk.f32.gmra.mrb[86].mxu1 %vm634_vm0, %v2415_v24 }
 0x4f2   : > { %v2417_v27 = vsel %vm2384_vm10, %v4771_v36, %v2401_v38 }
 0x4f3   : > { %v4774_v35 = vpop.f32.mrb[42].mxu0  ;;  %v2416_v56 = vsel %vm2383_vm11, %v2336_v43, %v2400_v37 }
 0x4f4   : > { %v2403_v59 = vmul.f32 %v4774_v35, %v6103_v40  ;;  %v2346_v31 = vpop.f32.mrb[43].mxu0  ;;  %4801 = vmatprep.mubr.msk.f32.mxu1 %vm634_vm0, %v2416_v56  ;;  %vm2386_vm12 = vcmp.ge.f32.partialorder %v4774_v35, 0.0 }
 0x4f5   : > { %vm2385_vm13 = vcmp.ge.f32.partialorder %v2346_v31, 0.0  ;;  %v2402_v19 = vmul.f32 %v6103_v40, %v2346_v31  ;;  %4802 = vmatmul.mubr.msk.f32.gmra.mrb[88].mxu1 %vm634_vm0, %v2417_v27 }
 0x4f6   : > { %v2419_v43 = vsel %vm2386_vm12, %v4774_v35, %v2403_v59 }
 0x4f7   : > { %v4777_v28 = vpop.f32.mrb[44].mxu0  ;;  %v2418_v25 = vsel %vm2385_vm13, %v2346_v31, %v2402_v19  ;;  %v5335_v19 = vmov 0  }
 0x4f8   : > { %v2405_v29 = vmul.f32 %v4777_v28, %v6103_v40  ;;  %v2356_v33 = vpop.f32.mrb[45].mxu0  ;;  %4804 = vmatprep.mubr.msk.f32.mxu1 %vm634_vm0, %v2418_v25  ;;  %vm2388_vm14 = vcmp.ge.f32.partialorder %v4777_v28, 0.0  ;;  %5063 = vset.pattern.permute.xlu1 %v5335_v19 }
 0x4f9   : > { %vm2387_vm15 = vcmp.ge.f32.partialorder %v2356_v33, 0.0  ;;  %v2404_v24 = vmul.f32 %v6103_v40, %v2356_v33  ;;  %4805 = vmatmul.mubr.msk.f32.gmra.mrb[90].mxu1 %vm634_vm0, %v2419_v43  ;;  %5064 = vset.pattern.permute.xlu0 %v5335_v19 }
 0x4fa   : > { %v2421_v31 = vsel %vm2388_vm14, %v4777_v28, %v2405_v29 }
 0x4fb   : > { %v4780_v36 = vpop.f32.mrb[46].mxu0  ;;  %v2420_v38 = vsel %vm2387_vm15, %v2356_v33, %v2404_v24  ;;  %v6137_v33 = vstv %s3925_s27 }
 0x4fc   : > { %v2407_v37 = vmul.f32 %v4780_v36, %v6103_v40  ;;  %v2366_v56 = vpop.f32.mrb[47].mxu0  ;;  %4807 = vmatprep.mubr.msk.f32.mxu1 %vm634_vm0, %v2420_v38  ;;  %vm2390_vm1 = vcmp.ge.f32.partialorder %v4780_v36, 0.0 }
 0x4fd   : > { %vm2389_vm2 = vcmp.ge.f32.partialorder %v2366_v56, 0.0  ;;  %v2406_v27 = vmul.f32 %v6103_v40, %v2366_v56  ;;  %4808 = vmatmul.mubr.msk.f32.gmra.mrb[92].mxu1 %vm634_vm0, %v2421_v31 }
 0x4fe   : > { %v2423_v59 = vsel %vm2390_vm1, %v4780_v36, %v2407_v37 }
 0x4ff   : > { %v2422_v35 = vsel %vm2389_vm2, %v2366_v56, %v2406_v27 }
 0x500   : > { %4810 = vmatprep.mubr.msk.f32.mxu1 %vm634_vm0, %v2422_v35 }
 0x501   : > { %4811 = vmatmul.mubr.msk.f32.gmra.mrb[94].mxu1 %vm634_vm0, %v2423_v59 }
 0x5b8   : > { %v4791_v25 = vpop.f32.mrb[80].mxu1 }
 0x5b9   : > { %v2618_v28 = vadd.f32 %v4791_v25, %v5674_v0  ;;  %v2667_v29 = vadd.f32 %v4791_v25, %v5891_v61  ;;  %v2715_v40 = vadd.f32 %v4791_v25, %v6039_v49  ;;  %v2538_v43 = vpop.f32.mrb[81].mxu1 }
 0x5ba   : > { %v2617_v24 = vadd.f32 %v2538_v43, %v5676_v1  ;;  %v2666_v36 = vadd.f32 %v2538_v43, %v5893_v62  ;;  %v2714_v38 = vadd.f32 %v2538_v43, %v6042_v57 }
 0x5bb   : > { %v2635_v37 = vadd.f32 %v6137_v33, %v2618_v28  ;;  %v2683_v56 = vadd.f32 %v2667_v29, %v6137_v33  ;;  %v2731_v31 = vadd.f32 %v2715_v40, %v6137_v33 }
 0x5bc   : > { %v2634_v27 = vadd.f32 %v6137_v33, %v2617_v24  ;;  %v2682_v0 = vadd.f32 %v2666_v36, %v6137_v33  ;;  %v2730_v61 = vadd.f32 %v2714_v38, %v6137_v33  ;;  %v4794_v49 = vpop.f32.mrb[82].mxu1 }
 0x5bd   : > { %v2651_v35 = vmax.f32 %v2635_v37, 0.0  ;;  %v2699_v59 = vmax.f32 %v2683_v56, 0.0  ;;  %v2747_v1 = vmax.f32 %v2731_v31, 0.0  ;;  %v2620_v62 = vadd.f32 %v4794_v49, %v5678_v2  ;;  %v2548_v19 = vpop.f32.mrb[83].mxu1 }
 0x5be   : > { %v2650_v57 = vmax.f32 %v2634_v27, 0.0  ;;  %v2698_v25 = vmax.f32 %v2682_v0, 0.0  ;;  %v2746_v28 = vmax.f32 %v2730_v61, 0.0  ;;  %v2669_v29 = vadd.f32 %v4794_v49, %v5895_v63 }
 0x5bf   : > { %v2763_v43 = vmax.f32 %v2651_v35, %v2699_v59  ;;  %v2637_v40 = vadd.f32 %v6137_v33, %v2620_v62  ;;  %v2717_v24 = vadd.f32 %v4794_v49, %v6045_v50  ;;  %v2619_v36 = vadd.f32 %v2548_v19, %v5680_v3 }
 0x5c0   : > { %v2762_v38 = vmax.f32 %v2650_v57, %v2698_v25  ;;  %v2685_v37 = vadd.f32 %v2669_v29, %v6137_v33  ;;  %v2668_v56 = vadd.f32 %v2548_v19, %v5897_v21  ;;  %v2716_v2 = vadd.f32 %v2548_v19, %v6048_v44  ;;  %v4797_v31 = vpop.f32.mrb[84].mxu1 }
 0x5c1   : > { %v2779_v27 = vmax.f32 %v2763_v43, %v2747_v1  ;;  %v2653_v0 = vmax.f32 %v2637_v40, 0.0  ;;  %v2733_v61 = vadd.f32 %v2717_v24, %v6137_v33  ;;  %v2636_v63 = vadd.f32 %v6137_v33, %v2619_v36  ;;  %v6161_v23 = vpop.f32.mrb[85].mxu1 }
 0x5c2   : > { %v2778_v62 = vmax.f32 %v2762_v38, %v2746_v28  ;;  %v2701_v50 = vmax.f32 %v2685_v37, 0.0  ;;  %v2684_v3 = vadd.f32 %v2668_v56, %v6137_v33  ;;  %v2732_v49 = vadd.f32 %v2716_v2, %v6137_v33 }
 0x5c3   : > { %v2795_v29 = vsub.f32 %v2651_v35, %v2779_v27  ;;  %v2843_v41 = vsub.f32 %v2699_v59, %v2779_v27  ;;  %v2891_v21 = vsub.f32 %v2747_v1, %v2779_v27  ;;  %v2749_v17 = vmax.f32 %v2733_v61, 0.0 }
 0x5c4   : > { %v2794_v44 = vsub.f32 %v2650_v57, %v2778_v62  ;;  %v2842_v19 = vsub.f32 %v2698_v25, %v2778_v62  ;;  %v2890_v43 = vsub.f32 %v2746_v28, %v2778_v62  ;;  %v2765_v40 = vmax.f32 %v2653_v0, %v2701_v50  ;;  %v6165_v45 = vpop.f32.mrb[86].mxu1 }
 0x5c5   : > { %v2812_v24 = vmul.f32 1.442695, %v2795_v29  ;;  %v2860_v36 = vmul.f32 1.442695, %v2843_v41  ;;  %v2908_v58 = vmul.f32 1.442695, %v2891_v21  ;;  %v2622_v38 = vadd.f32 %v4797_v31, %v5682_v4 }
 0x5c6   : > { %v2810_v37 = vmul.f32 1.442695, %v2794_v44  ;;  %v2858_v16 = vmul.f32 1.442695, %v2842_v19  ;;  %v2906_v56 = vmul.f32 1.442695, %v2890_v43  ;;  %v2781_v55 = vmax.f32 %v2765_v40, %v2749_v17 }
 0x5c7   : > { %5113 = vpow2.f32 %v2812_v24  ;;  %v2652_v35 = vmax.f32 %v2636_v63, 0.0  ;;  %v2700_v59 = vmax.f32 %v2684_v3, 0.0  ;;  %v2748_v1 = vmax.f32 %v2732_v49, 0.0  ;;  %v6168_v2 = vpop.f32.mrb[87].mxu1 }
 0x5c8   : > { %5115 = vpow2.f32 %v2860_v36  ;;  %v2797_v57 = vsub.f32 %v2653_v0, %v2781_v55  ;;  %v2845_v25 = vsub.f32 %v2701_v50, %v2781_v55  ;;  %v2893_v28 = vsub.f32 %v2749_v17, %v2781_v55  ;;  %v6170_v27 = vpop.f32.mrb[88].mxu1 }
 0x5c9   : > { %5117 = vpow2.f32 %v2908_v58  ;;  %v2764_v41 = vmax.f32 %v2652_v35, %v2700_v59  ;;  %v2639_v4 = vadd.f32 %v6137_v33, %v2622_v38  ;;  %v2671_v61 = vadd.f32 %v4797_v31, %v5899_v10  ;;  %v6174_v62 = vpop.f32.mrb[89].mxu1 }
 0x5ca   : > { %5119 = vpow2.f32 %v2810_v37  ;;  %v2816_v63 = vmul.f32 1.442695, %v2797_v57  ;;  %v2864_v3 = vmul.f32 1.442695, %v2845_v25  ;;  %v2912_v49 = vmul.f32 1.442695, %v2893_v28 }
 0x5cb   : > { %5121 = vpow2.f32 %v2858_v16  ;;  %v2780_v29 = vmax.f32 %v2764_v41, %v2748_v1  ;;  %v2655_v21 = vmax.f32 %v2639_v4, 0.0  ;;  %v2687_v0 = vadd.f32 %v2671_v61, %v6137_v33 }
 0x5cc   : > { %5123 = vpow2.f32 %v2906_v56  ;;  %v2719_v17 = vadd.f32 %v4797_v31, %v6053_v60  ;;  %v2621_v58 = vadd.f32 %v6161_v23, %v5684_v5  ;;  %v2670_v10 = vadd.f32 %v6161_v23, %v5901_v22  ;;  %v6182_v55 = vpop.f32.mrb[90].mxu1 }
 0x5cd   : > { %5125 = vpow2.f32 %v2816_v63  ;;  %v2796_v50 = vsub.f32 %v2652_v35, %v2780_v29  ;;  %v2844_v44 = vsub.f32 %v2700_v59, %v2780_v29  ;;  %v2892_v19 = vsub.f32 %v2748_v1, %v2780_v29  ;;  %v6184_v16 = vpop.f32.mrb[91].mxu1 }
 0x5ce   : > { %5127 = vpow2.f32 %v2864_v3  ;;  %v2703_v43 = vmax.f32 %v2687_v0, 0.0  ;;  %v2735_v40 = vadd.f32 %v2719_v17, %v6137_v33  ;;  %v2638_v60 = vadd.f32 %v6137_v33, %v2621_v58 }
 0x5cf   : > { %5129 = vpow2.f32 %v2912_v49  ;;  %v2814_v31 = vmul.f32 1.442695, %v2796_v50  ;;  %v2862_v5 = vmul.f32 1.442695, %v2844_v44  ;;  %v2910_v24 = vmul.f32 1.442695, %v2892_v19 }
 0x5d0   : > { %v2751_v36 = vmax.f32 %v2735_v40, 0.0  ;;  %v2767_v22 = vmax.f32 %v2655_v21, %v2703_v43  ;;  %v2654_v38 = vmax.f32 %v2638_v60, 0.0  ;;  %v2686_v37 = vadd.f32 %v2670_v10, %v6137_v33  ;;  %v6189_v56 = vpop.f32.mrb[92].mxu1 }
 0x5d1   : > { %v6191_v35 = vpop.eup %5113  ;;  %5131 = vpow2.f32 %v2814_v31  ;;  %v2718_v59 = vadd.f32 %v6161_v23, %v6057_v51  ;;  %v2624_v1 = vadd.f32 %v6165_v45, %v5686_v6  ;;  %v2673_v57 = vadd.f32 %v6165_v45, %v5903_v13  ;;  %v6199_v25 = vpop.f32.mrb[93].mxu1 }
 0x5d2   : > { %v6201_v28 = vpop.eup %5115  ;;  %5133 = vpow2.f32 %v2862_v5  ;;  %v2783_v41 = vmax.f32 %v2767_v22, %v2751_v36  ;;  %v2702_v4 = vmax.f32 %v2686_v37, 0.0  ;;  %v2721_v61 = vadd.f32 %v6165_v45, %v6061_v47 }
 0x5d3   : > { %v6205_v63 = vpop.eup %5117  ;;  %v2939_v51 = vadd.f32 %v6201_v28, %v6191_v35  ;;  %5135 = vpow2.f32 %v2910_v24  ;;  %v2734_v6 = vadd.f32 %v2718_v59, %v6137_v33  ;;  %v2641_v13 = vadd.f32 %v6137_v33, %v2624_v1 }
 0x5d4   : > { %v6211_v23 = vpop.eup %5119  ;;  %v2799_v3 = vsub.f32 %v2655_v21, %v2783_v41  ;;  %v2847_v49 = vsub.f32 %v2703_v43, %v2783_v41  ;;  %v2895_v29 = vsub.f32 %v2751_v36, %v2783_v41  ;;  %v2766_v0 = vmax.f32 %v2654_v38, %v2702_v4  ;;  %v6213_v17 = vpop.f32.mrb[94].mxu1 }
 0x5d5   : > { %v6215_v58 = vpop.eup %5121  ;;  %v2955_v45 = vadd.f32 %v6205_v63, %v2939_v51  ;;  %v2750_v47 = vmax.f32 %v2734_v6, 0.0  ;;  %v2657_v10 = vmax.f32 %v2641_v13, 0.0  ;;  %v2689_v50 = vadd.f32 %v2673_v57, %v6137_v33  ;;  %v6219_v44 = vpop.f32.mrb[95].mxu1 }
 0x5d6   : > { %v6221_v19 = vpop.eup %5123  ;;  %v2938_v21 = vadd.f32 %v6215_v58, %v6211_v23  ;;  %v2820_v43 = vmul.f32 1.442695, %v2799_v3  ;;  %v2868_v40 = vmul.f32 1.442695, %v2847_v49  ;;  %v2916_v60 = vmul.f32 1.442695, %v2895_v29 }
 0x5d7   : > { %v6225_v31 = vpop.eup %5125  ;;  %5137 = vrcp.f32 %v2955_v45  ;;  %v2782_v5 = vmax.f32 %v2766_v0, %v2750_v47  ;;  %v2705_v24 = vmax.f32 %v2689_v50, 0.0  ;;  %v2737_v36 = vadd.f32 %v2721_v61, %v6137_v33 }
 0x5d8   : > { %v6228_v22 = vpop.eup %5127  ;;  %v2954_v37 = vadd.f32 %v6221_v19, %v2938_v21  ;;  %5139 = vpow2.f32 %v2820_v43  ;;  %v2623_v59 = vadd.f32 %v6168_v2, %v5688_v7  ;;  %v2672_v1 = vadd.f32 %v6168_v2, %v5905_v26 }
 0x5d9   : > { %v6235_v57 = vpop.eup %5129  ;;  %v2941_v41 = vadd.f32 %v6228_v22, %v6225_v31  ;;  %5141 = vpow2.f32 %v2868_v40  ;;  %v2798_v51 = vsub.f32 %v2654_v38, %v2782_v5  ;;  %v2846_v6 = vsub.f32 %v2702_v4, %v2782_v5 }
 0x5da   : > { %5143 = vrcp.f32 %v2954_v37  ;;  %v2894_v61 = vsub.f32 %v2750_v47, %v2782_v5  ;;  %v2753_v13 = vmax.f32 %v2737_v36, 0.0  ;;  %v2769_v3 = vmax.f32 %v2657_v10, %v2705_v24 }
 0x5db   : > { %v6239_v49 = vpop.eup %5131  ;;  %v2957_v29 = vadd.f32 %v6235_v57, %v2941_v41  ;;  %5145 = vpow2.f32 %v2916_v60  ;;  %v2818_v7 = vmul.f32 1.442695, %v2798_v51  ;;  %v2866_v0 = vmul.f32 1.442695, %v2846_v6 }
 0x5dc   : > { %v6242_v26 = vpop.eup %5133  ;;  %v2914_v45 = vmul.f32 1.442695, %v2894_v61  ;;  %v2785_v50 = vmax.f32 %v2769_v3, %v2753_v13  ;;  %v2640_v21 = vadd.f32 %v6137_v33, %v2623_v59  ;;  %v2688_v38 = vadd.f32 %v2672_v1, %v6137_v33 }
 0x5dd   : > { %v6246_v4 = vpop.eup %5135  ;;  %5147 = vrcp.f32 %v2957_v29  ;;  %v2940_v47 = vadd.f32 %v6242_v26, %v6239_v49  ;;  %v2720_v43 = vadd.f32 %v6168_v2, %v6065_v30  ;;  %v2626_v40 = vadd.f32 %v6170_v27, %v5690_v8 }
 0x5de   : > { %5149 = vpow2.f32 %v2818_v7  ;;  %v2801_v60 = vsub.f32 %v2657_v10, %v2785_v50  ;;  %v2849_v5 = vsub.f32 %v2705_v24, %v2785_v50  ;;  %v2897_v36 = vsub.f32 %v2753_v13, %v2785_v50 }
 0x5df   : > { %v2956_v37 = vadd.f32 %v6246_v4, %v2940_v47  ;;  %5151 = vpow2.f32 %v2866_v0  ;;  %v2656_v59 = vmax.f32 %v2640_v21, 0.0  ;;  %v2704_v1 = vmax.f32 %v2688_v38, 0.0 }
 0x5e0   : > { %5153 = vpow2.f32 %v2914_v45  ;;  %v2824_v41 = vmul.f32 1.442695, %v2801_v60  ;;  %v2872_v51 = vmul.f32 1.442695, %v2849_v5  ;;  %v2920_v6 = vmul.f32 1.442695, %v2897_v36 }
 0x5e1   : > { %v6255_v61 = vpop.eup %5137  ;;  %5155 = vrcp.f32 %v2956_v37  ;;  %v2736_v30 = vadd.f32 %v2720_v43, %v6137_v33  ;;  %v2768_v2 = vmax.f32 %v2656_v59, %v2704_v1  ;;  %v2643_v8 = vadd.f32 %v6137_v33, %v2626_v40 }
 0x5e2   : > { %v6259_v10 = vpop.eup %5139  ;;  %5157 = vpow2.f32 %v2824_v41  ;;  %v2675_v24 = vadd.f32 %v6170_v27, %v5907_v32  ;;  %v2723_v13 = vadd.f32 %v6170_v27, %v6069_v18  ;;  %v2625_v3 = vadd.f32 %v6174_v62, %v5692_v9 }
 0x5e3   : > { %v6267_v29 = vpop.eup %5141  ;;  %5159 = vpow2.f32 %v2872_v51  ;;  %v2752_v7 = vmax.f32 %v2736_v30, 0.0  ;;  %v2659_v0 = vmax.f32 %v2643_v8, 0.0  ;;  %v2674_v45 = vadd.f32 %v6174_v62, %v5909_v34 }
 0x5e4   : > { %v6271_v50 = vpop.eup %5143  ;;  %v2943_v21 = vadd.f32 %v6267_v29, %v6259_v10  ;;  %5161 = vpow2.f32 %v2920_v6  ;;  %v2691_v32 = vadd.f32 %v2675_v24, %v6137_v33  ;;  %v2739_v18 = vadd.f32 %v2723_v13, %v6137_v33 }
 0x5e5   : > { %v6277_v27 = vpop.eup %5145  ;;  %v2784_v9 = vmax.f32 %v2768_v2, %v2752_v7  ;;  %v2642_v38 = vadd.f32 %v6137_v33, %v2625_v3  ;;  %v2690_v47 = vadd.f32 %v2674_v45, %v6137_v33  ;;  %v2722_v34 = vadd.f32 %v6174_v62, %v6073_v39 }
 0x5e6   : > { %v2959_v43 = vadd.f32 %v6277_v27, %v2943_v21  ;;  %v2707_v40 = vmax.f32 %v2691_v32, 0.0  ;;  %v2755_v60 = vmax.f32 %v2739_v18, 0.0  ;;  %v2628_v5 = vadd.f32 %v6182_v55, %v5694_v11 }
 0x5e7   : > { %v6286_v36 = vpop.eup %5147  ;;  %v2800_v37 = vsub.f32 %v2656_v59, %v2784_v9  ;;  %v2848_v41 = vsub.f32 %v2704_v1, %v2784_v9  ;;  %v2896_v51 = vsub.f32 %v2752_v7, %v2784_v9  ;;  %v2658_v6 = vmax.f32 %v2642_v38, 0.0 }
 0x5e8   : > { %v6288_v30 = vpop.eup %5149  ;;  %5163 = vrcp.f32 %v2959_v43  ;;  %v2771_v2 = vmax.f32 %v2659_v0, %v2707_v40  ;;  %v2706_v8 = vmax.f32 %v2690_v47, 0.0  ;;  %v2738_v39 = vadd.f32 %v2722_v34, %v6137_v33 }
 0x5e9   : > { %v6291_v62 = vpop.eup %5151  ;;  %v2822_v24 = vmul.f32 1.442695, %v2800_v37  ;;  %v2870_v13 = vmul.f32 1.442695, %v2848_v41  ;;  %v2918_v3 = vmul.f32 1.442695, %v2896_v51  ;;  %v2645_v11 = vadd.f32 %v6137_v33, %v2628_v5 }
 0x5ea   : > { %v6294_v45 = vpop.eup %5153  ;;  %v2942_v59 = vadd.f32 %v6291_v62, %v6288_v30  ;;  %v2787_v1 = vmax.f32 %v2771_v2, %v2755_v60  ;;  %v2754_v7 = vmax.f32 %v2738_v39, 0.0  ;;  %v2770_v21 = vmax.f32 %v2658_v6, %v2706_v8 }
 0x5eb   : > { %v6298_v32 = vpop.eup %5155  ;;  %5165 = vpow2.f32 %v2822_v24  ;;  %v2661_v18 = vmax.f32 %v2645_v11, 0.0  ;;  %v2677_v9 = vadd.f32 %v6182_v55, %v5911_v46  ;;  %v2725_v38 = vadd.f32 %v6182_v55, %v6077_v42 }
 0x5ec   : > { %v6304_v47 = vpop.eup %5157  ;;  %v2958_v34 = vadd.f32 %v6294_v45, %v2942_v59  ;;  %5167 = vpow2.f32 %v2870_v13  ;;  %v2803_v43 = vsub.f32 %v2659_v0, %v2787_v1  ;;  %v2851_v5 = vsub.f32 %v2707_v40, %v2787_v1 }
 0x5ed   : > { %v6307_v37 = vpop.eup %5159  ;;  %5169 = vpow2.f32 %v2918_v3  ;;  %v2899_v41 = vsub.f32 %v2755_v60, %v2787_v1  ;;  %v2786_v51 = vmax.f32 %v2770_v21, %v2754_v7  ;;  %v2693_v2 = vadd.f32 %v2677_v9, %v6137_v33 }
 0x5ee   : > { %v6310_v39 = vpop.eup %5161  ;;  %5171 = vrcp.f32 %v2958_v34  ;;  %v2945_v42 = vadd.f32 %v6307_v37, %v6304_v47  ;;  %v2828_v46 = vmul.f32 1.442695, %v2803_v43  ;;  %v2876_v55 = vmul.f32 1.442695, %v2851_v5 }
 0x5ef   : > { %v2924_v24 = vmul.f32 1.442695, %v2899_v41  ;;  %v2802_v11 = vsub.f32 %v2658_v6, %v2786_v51  ;;  %v2850_v13 = vsub.f32 %v2706_v8, %v2786_v51  ;;  %v2898_v0 = vsub.f32 %v2754_v7, %v2786_v51 }
 0x5f0   : > { %v2961_v40 = vadd.f32 %v6310_v39, %v2945_v42  ;;  %5173 = vpow2.f32 %v2828_v46  ;;  %v2709_v3 = vmax.f32 %v2693_v2, 0.0  ;;  %v2741_v60 = vadd.f32 %v2725_v38, %v6137_v33 }
 0x5f1   : > { %5175 = vpow2.f32 %v2876_v55  ;;  %v2826_v59 = vmul.f32 1.442695, %v2802_v11  ;;  %v2874_v1 = vmul.f32 1.442695, %v2850_v13  ;;  %v2922_v21 = vmul.f32 1.442695, %v2898_v0 }
 0x5f2   : > { %v6316_v9 = vpop.eup %5163  ;;  %5177 = vrcp.f32 %v2961_v40  ;;  %v2757_v34 = vmax.f32 %v2741_v60, 0.0  ;;  %v2773_v43 = vmax.f32 %v2661_v18, %v2709_v3  ;;  %v2627_v6 = vadd.f32 %v6184_v16, %v5696_v12 }
 0x5f3   : > { %5179 = vpow2.f32 %v2924_v24  ;;  %v2676_v8 = vadd.f32 %v6184_v16, %v5913_v48  ;;  %v2724_v7 = vadd.f32 %v6184_v16, %v6081_v53  ;;  %v2630_v38 = vadd.f32 %v6189_v56, %v5698_v14 }
 0x5f4   : > { %5181 = vpow2.f32 %v2826_v59  ;;  %v2789_v5 = vmax.f32 %v2773_v43, %v2757_v34  ;;  %v2644_v41 = vadd.f32 %v6137_v33, %v2627_v6  ;;  %v2679_v51 = vadd.f32 %v6189_v56, %v5915_v52 }
 0x5f5   : > { %v6329_v2 = vpop.eup %5165  ;;  %5183 = vpow2.f32 %v2874_v1  ;;  %v2692_v12 = vadd.f32 %v2676_v8, %v6137_v33  ;;  %v2740_v48 = vadd.f32 %v2724_v7, %v6137_v33  ;;  %v2647_v42 = vadd.f32 %v6137_v33, %v2630_v38 }
 0x5f6   : > { %v6334_v53 = vpop.eup %5167  ;;  %5185 = vpow2.f32 %v2922_v21  ;;  %v2805_v14 = vsub.f32 %v2661_v18, %v2789_v5  ;;  %v2853_v16 = vsub.f32 %v2709_v3, %v2789_v5  ;;  %v2901_v46 = vsub.f32 %v2757_v34, %v2789_v5 }
 0x5f7   : > { %v6336_v55 = vpop.eup %5169  ;;  %v2944_v52 = vadd.f32 %v6334_v53, %v6329_v2  ;;  %v2660_v24 = vmax.f32 %v2644_v41, 0.0  ;;  %v2708_v11 = vmax.f32 %v2692_v12, 0.0  ;;  %v2756_v13 = vmax.f32 %v2740_v48, 0.0 }
 0x5f8   : > { %v6340_v0 = vpop.eup %5171  ;;  %v2832_v40 = vmul.f32 1.442695, %v2805_v14  ;;  %v2880_v60 = vmul.f32 1.442695, %v2853_v16  ;;  %v2928_v59 = vmul.f32 1.442695, %v2901_v46  ;;  %v2695_v1 = vadd.f32 %v2679_v51, %v6137_v33 }
 0x5f9   : > { %v2960_v21 = vadd.f32 %v6336_v55, %v2944_v52  ;;  %v2772_v18 = vmax.f32 %v2660_v24, %v2708_v11  ;;  %v2663_v3 = vmax.f32 %v2647_v42, 0.0  ;;  %v2727_v34 = vadd.f32 %v6189_v56, %v6085_v20  ;;  %v6888_v51 = vld [vmem:[#allocation70_spill] sm:$0xff] }
 0x5fa   : > { %v6346_v43 = vpop.eup %5173  ;;  %5187 = vpow2.f32 %v2832_v40  ;;  %v2711_v6 = vmax.f32 %v2695_v1, 0.0  ;;  %v2629_v8 = vadd.f32 %v6199_v25, %v5700_v15  ;;  %v2678_v7 = vadd.f32 %v6199_v25, %v5917_v54 }
 0x5fb   : > { %v6352_v38 = vpop.eup %5175  ;;  %5189 = vrcp.f32 %v2960_v21  ;;  %v2788_v5 = vmax.f32 %v2772_v18, %v2756_v13  ;;  %v2743_v41 = vadd.f32 %v2727_v34, %v6137_v33  ;;  %v2726_v12 = vadd.f32 %v6199_v25, %v6888_v51 }
 0x5fc   : > { %v6357_v20 = vpop.eup %5177  ;;  %v2947_v56 = vadd.f32 %v6352_v38, %v6346_v43  ;;  %5191 = vpow2.f32 %v2880_v60  ;;  %v2775_v48 = vmax.f32 %v2663_v3, %v2711_v6  ;;  %v2646_v15 = vadd.f32 %v6137_v33, %v2629_v8 }
 0x5fd   : > { %v6362_v42 = vpop.eup %5179  ;;  %5193 = vpow2.f32 %v2928_v59  ;;  %v2804_v54 = vsub.f32 %v2660_v24, %v2788_v5  ;;  %v2852_v14 = vsub.f32 %v2708_v11, %v2788_v5  ;;  %v2900_v16 = vsub.f32 %v2756_v13, %v2788_v5  ;;  %v6892_v5 = vld [vmem:[#allocation34_spill] sm:$0xff] }
 0x5fe   : > { %v6364_v46 = vpop.eup %5181  ;;  %v2963_v52 = vadd.f32 %v6362_v42, %v2947_v56  ;;  %v2759_v25 = vmax.f32 %v2743_v41, 0.0  ;;  %v2662_v40 = vmax.f32 %v2646_v15, 0.0  ;;  %v2694_v1 = vadd.f32 %v2678_v7, %v6137_v33  ;;  %v6893_v41 = vld [vmem:[#allocation52_spill] sm:$0xff] }
 0x5ff   : > { %6889 = vst [vmem:[#allocation70_spill] sm:$0xff] %v6364_v46  ;;  %v6368_v21 = vpop.eup %5183  ;;  %v2830_v60 = vmul.f32 1.442695, %v2804_v54  ;;  %v2878_v18 = vmul.f32 1.442695, %v2852_v14  ;;  %v2742_v8 = vadd.f32 %v2726_v12, %v6137_v33  ;;  %v2632_v7 = vadd.f32 %v6213_v17, %v6892_v5 }
 0x600   : > { %6890 = vst [vmem:[#allocation73_spill] sm:$0xff] %v6368_v21  ;;  %v2926_v34 = vmul.f32 1.442695, %v2900_v16  ;;  %v6371_v51 = vpop.eup %5185  ;;  %5195 = vrcp.f32 %v2963_v52  ;;  %v2946_v24 = vadd.f32 %v6368_v21, %v6364_v46  ;;  %v2791_v11 = vmax.f32 %v2775_v48, %v2759_v25 }
 0x601   : > { %6891 = vst [vmem:[#allocation74_spill] sm:$0xff] %v6371_v51  ;;  %v2710_v13 = vmax.f32 %v2694_v1, 0.0  ;;  %5197 = vpow2.f32 %v2830_v60  ;;  %v2758_v59 = vmax.f32 %v2742_v8, 0.0  ;;  %v2681_v56 = vadd.f32 %v6213_v17, %v6893_v41 }
 0x602   : > { %v2962_v15 = vadd.f32 %v6371_v51, %v2946_v24  ;;  %5199 = vpow2.f32 %v2878_v18  ;;  %v2807_v12 = vsub.f32 %v2663_v3, %v2791_v11  ;;  %v2855_v54 = vsub.f32 %v2711_v6, %v2791_v11  ;;  %v6895_v18 = vld [vmem:[#allocation71_spill] sm:$0xff] }
 0x603   : > { %5201 = vpow2.f32 %v2926_v34  ;;  %v2903_v14 = vsub.f32 %v2759_v25, %v2791_v11  ;;  %v2774_v16 = vmax.f32 %v2662_v40, %v2710_v13  ;;  %v2649_v52 = vadd.f32 %v6137_v33, %v2632_v7  ;;  %v6896_v34 = vld [vmem:[#allocation35_spill] sm:$0xff]  ;;  %v6897_v7 = vld [vmem:[#allocation53_spill] sm:$0xff] }
 0x604   : > { %v6381_v48 = vpop.eup %5187  ;;  %5203 = vrcp.f32 %v2962_v15  ;;  %v2836_v1 = vmul.f32 1.442695, %v2807_v12  ;;  %v2884_v60 = vmul.f32 1.442695, %v2855_v54  ;;  %v2697_v8 = vadd.f32 %v2681_v56, %v6137_v33 }
 0x605   : > { %6894 = vst [vmem:[#allocation34_spill] sm:$0xff] %v6381_v48  ;;  %v6384_v5 = vpop.eup %5189  ;;  %v2932_v41 = vmul.f32 1.442695, %v2903_v14  ;;  %v2790_v21 = vmax.f32 %v2774_v16, %v2758_v59  ;;  %v2665_v24 = vmax.f32 %v2649_v52, 0.0  ;;  %v2729_v3 = vadd.f32 %v6213_v17, %v6895_v18 }
 0x606   : > { %v6388_v6 = vpop.eup %5191  ;;  %5205 = vpow2.f32 %v2836_v1  ;;  %v2713_v25 = vmax.f32 %v2697_v8, 0.0  ;;  %v2631_v11 = vadd.f32 %v6219_v44, %v6896_v34  ;;  %v2680_v15 = vadd.f32 %v6219_v44, %v6897_v7 }
 0x607   : > { %v6394_v12 = vpop.eup %5193  ;;  %v2949_v56 = vadd.f32 %v6388_v6, %v6381_v48  ;;  %5207 = vpow2.f32 %v2884_v60  ;;  %v2806_v54 = vsub.f32 %v2662_v40, %v2790_v21  ;;  %v2854_v14 = vsub.f32 %v2710_v13, %v2790_v21  ;;  %v6898_v60 = vld [vmem:[#allocation72_spill] sm:$0xff] }
 0x608   : > { %5209 = vpow2.f32 %v2932_v41  ;;  %v2902_v17 = vsub.f32 %v2758_v59, %v2790_v21  ;;  %v2745_v16 = vadd.f32 %v2729_v3, %v6137_v33  ;;  %v2777_v52 = vmax.f32 %v2665_v24, %v2713_v25 }
 0x609   : > { %v2965_v1 = vadd.f32 %v6394_v12, %v2949_v56  ;;  %v2834_v8 = vmul.f32 1.442695, %v2806_v54  ;;  %v2882_v18 = vmul.f32 1.442695, %v2854_v14  ;;  %v2648_v34 = vadd.f32 %v6137_v33, %v2631_v11 }
 0x60a   : > { %v6401_v7 = vpop.eup %5195  ;;  %v2930_v51 = vmul.f32 1.442695, %v2902_v17  ;;  %v2761_v46 = vmax.f32 %v2745_v16, 0.0  ;;  %v2696_v48 = vadd.f32 %v2680_v15, %v6137_v33  ;;  %v2728_v40 = vadd.f32 %v6219_v44, %v6898_v60 }
 0x60b   : > { %v6406_v13 = vpop.eup %5197  ;;  %5211 = vrcp.f32 %v2965_v1  ;;  %v2664_v21 = vmax.f32 %v2648_v34, 0.0  ;;  %v2987_v59 = vmul.f32 %v6255_v61, %v6191_v35  ;;  %v2986_v41 = vmul.f32 %v6271_v50, %v6211_v23 }
 0x60c   : > { %v6412_v3 = vpop.eup %5199  ;;  %5213 = vpow2.f32 %v2834_v8  ;;  %v2793_v11 = vmax.f32 %v2777_v52, %v2761_v46  ;;  %v2712_v56 = vmax.f32 %v2696_v48, 0.0  ;;  %v2744_v15 = vadd.f32 %v2728_v40, %v6137_v33 }
 0x60d   : > { %v6415_v54 = vpop.eup %5201  ;;  %v2948_v44 = vadd.f32 %v6412_v3, %v6406_v13  ;;  %5215 = vpow2.f32 %v2882_v18  ;;  %3009 = vperm.xlu1 %5063, %v2987_v59   ;;  %3004 = vperm.xlu0 %5064, %v2986_v41   ;;  %v3099_v35 = vmul.f32 %v6255_v61, %v6201_v28  ;;  %v3098_v23 = vmul.f32 %v6271_v50, %v6215_v58 }
 0x60e   : > { %v6423_v14 = vpop.eup %5203  ;;  %5217 = vpow2.f32 %v2930_v51  ;;  %v2809_v48 = vsub.f32 %v2665_v24, %v2793_v11  ;;  %v2857_v17 = vsub.f32 %v2713_v25, %v2793_v11  ;;  %v2905_v33 = vsub.f32 %v2761_v46, %v2793_v11 }
 0x60f   : > { %v2964_v16 = vadd.f32 %v6415_v54, %v2948_v44  ;;  %v2760_v52 = vmax.f32 %v2744_v15, 0.0  ;;  %v2776_v1 = vmax.f32 %v2664_v21, %v2712_v56  ;;  %v3227_v8 = vmul.f32 %v6255_v61, %v6205_v63 }
 0x610   : > { %v6428_v18 = vpop.eup %5205  ;;  %v2840_v34 = vmul.f32 1.442695, %v2809_v48  ;;  %v2888_v28 = vmul.f32 1.442695, %v2857_v17  ;;  %v2936_v60 = vmul.f32 1.442695, %v2905_v33  ;;  %v3226_v58 = vmul.f32 %v6271_v50, %v6221_v19 }
 0x611   : > { %v6432_v40 = vpop.eup %5207  ;;  %5219 = vrcp.f32 %v2964_v16  ;;  %v2792_v51 = vmax.f32 %v2776_v1, %v2760_v52  ;;  %3121 = vperm.xlu1 %5063, %v3099_v35   ;;  %3116 = vperm.xlu0 %5064, %v3098_v23   ;;  %v3101_v46 = vmul.f32 %v6286_v36, %v6228_v22  ;;  %v2989_v63 = vmul.f32 %v6286_v36, %v6225_v31  ;;  %v6899_v23 = vld [vmem:[#allocation70_spill] sm:$0xff]  ;;  %v6900_v48 = vld [vmem:[#allocation73_spill] sm:$0xff]  ;;  %v3356_v33 = vld [vmem:[%s6759_s6 + $0x10] sm:$0xff] }
 0x612   : > { %v6438_v61 = vpop.eup %5209  ;;  %v2951_v24 = vadd.f32 %v6432_v40, %v6428_v18  ;;  %5221 = vpow2.f32 %v2840_v34  ;;  %v3229_v19 = vmul.f32 %v6286_v36, %v6235_v57  ;;  %v2988_v50 = vmul.f32 %v6298_v32, %v6239_v49  ;;  %v6901_v17 = vld [vmem:[#allocation74_spill] sm:$0xff]  ;;  %v3357_v16 = vld [vmem:[%s6759_s6 + $0x18] sm:$0xff] }
 0x613   : > { %5223 = vpow2.f32 %v2888_v28  ;;  %v2808_v25 = vsub.f32 %v2664_v21, %v2792_v51  ;;  %v2856_v59 = vsub.f32 %v2712_v56, %v2792_v51  ;;  %v2904_v41 = vsub.f32 %v2760_v52, %v2792_v51  ;;  %v6902_v1 = vld [vmem:[#allocation34_spill] sm:$0xff] }
 0x614   : > { %v2967_v22 = vadd.f32 %v6438_v61, %v2951_v24  ;;  %5225 = vpow2.f32 %v2936_v60  ;;  %v3100_v31 = vmul.f32 %v6298_v32, %v6242_v26  ;;  %v3228_v11 = vmul.f32 %v6298_v32, %v6246_v4 }
 0x615   : > { %v5212_v15 = vpop.eup %5211  ;;  %v2838_v44 = vmul.f32 1.442695, %v2808_v25  ;;  %v2886_v35 = vmul.f32 1.442695, %v2856_v59  ;;  %v2934_v57 = vmul.f32 1.442695, %v2904_v41  ;;  %3249 = vperm.xlu1 %5063, %v3227_v8   ;;  %3244 = vperm.xlu0 %5064, %v3226_v58   ;;  %v6453_v49 = vmul.f32 %v6316_v9, %v6267_v29 }
 0x616   : > { %v6455_v36 = vpop.eup %5213  ;;  %5227 = vrcp.f32 %v2967_v22  ;;  %v6459_v21 = vmul.f32 %v6316_v9, %v6259_v10  ;;  %v6463_v26 = vmul.f32 %v6316_v9, %v6277_v27  ;;  %v6467_v4 = vmul.f32 %v6340_v0, %v6288_v30 }
 0x617   : > { %v6469_v32 = vpop.eup %5215  ;;  %5229 = vpow2.f32 %v2838_v44  ;;  %v6473_v29 = vmul.f32 %v6340_v0, %v6291_v62  ;;  %v6477_v56 = vmul.f32 %v6340_v0, %v6294_v45  ;;  %v6481_v10 = vmul.f32 %v6357_v20, %v6307_v37 }
 0x618   : > { %v5218_v27 = vpop.eup %5217  ;;  %v2950_v30 = vadd.f32 %v6469_v32, %v6455_v36  ;;  %5231 = vpow2.f32 %v2886_v35  ;;  %v6487_v9 = vmul.f32 %v6357_v20, %v6304_v47  ;;  %v6491_v62 = vmul.f32 %v6357_v20, %v6310_v39 }
 0x619   : > { %5233 = vpow2.f32 %v2934_v57  ;;  %3131 = vperm.xlu1 %5063, %v3101_v46   ;;  %3019 = vperm.xlu0 %5064, %v2989_v63   ;;  %v6495_v45 = vmul.f32 %v6384_v5, %v6329_v2  ;;  %v6499_v37 = vmul.f32 %v6384_v5, %v6334_v53  ;;  %v6503_v0 = vmul.f32 %v6384_v5, %v6336_v55  ;;  %v3354_v53 = vld [vmem:[%s6759_s6] sm:$0xff]  ;;  %v3355_v55 = vld [vmem:[%s6759_s6 + $0x8] sm:$0xff] }
 0x61a   : > { %v2966_v47 = vadd.f32 %v5218_v27, %v2950_v30  ;;  %v6507_v39 = vmul.f32 %v6401_v7, %v6352_v38  ;;  %v6511_v20 = vmul.f32 %v6401_v7, %v6346_v43  ;;  %v6515_v2 = vmul.f32 %v6401_v7, %v6362_v42 }
 0x61b   : > { %v5220_v5 = vpop.eup %5219  ;;  %v6525_v38 = vmul.f32 %v6423_v14, %v6899_v23  ;;  %v6529_v43 = vmul.f32 %v6423_v14, %v6900_v48  ;;  %v6533_v42 = vmul.f32 %v6423_v14, %v6901_v17  ;;  %v6536_v7 = vmul.f32 %v5212_v15, %v6388_v6  ;;  %v6908_v23 = vld [vmem:[#allocation55_spill] sm:$0xff] }
 0x61c   : > { %v5222_v52 = vpop.eup %5221  ;;  %5235 = vrcp.f32 %v2966_v47  ;;  %v2997_v8 = vmul.f32 %v5212_v15, %v6902_v1  ;;  %v3237_v34 = vmul.f32 %v5212_v15, %v6394_v12  ;;  %v2996_v14 = vmul.f32 %v5220_v5, %v6406_v13 }
 0x61d   : > { %v5224_v28 = vpop.eup %5223  ;;  %3259 = vperm.xlu1 %5063, %v3229_v19   ;;  %3014 = vperm.xlu0 %5064, %v2988_v50   ;;  %v3108_v6 = vmul.f32 %v5220_v5, %v6412_v3  ;;  %v3236_v60 = vmul.f32 %v5220_v5, %v6415_v54  ;;  %v4941_v58 = vpack.c.bf16 %v3355_v55, %v3354_v53  ;;  %v6907_v55 = vld [vmem:[#allocation57_spill] sm:$0xff] }
 0x61e   : > { %v5226_v51 = vpop.eup %5225  ;;  %v2953_v46 = vadd.f32 %v5224_v28, %v5222_v52  ;;  %v4945_v63 = vpack.c.bf16 %v3357_v16, %v3356_v33  ;;  %v6910_v16 = vld [vmem:[#allocation20_spill] sm:$0xff] }
 0x61f   : > { %4942 = vmatprep.subr.bf16.mxu0 %v4941_v58 }
 0x620   : > { %v5228_v24 = vpop.eup %5227  ;;  %v2969_v25 = vadd.f32 %v5226_v51, %v2953_v46  ;;  %4944 = vmatpush3.bf16.msra.mxu0 %v4941_v58 }
 0x621   : > { %v5230_v59 = vpop.eup %5229  ;;  %3126 = vperm.xlu1 %5063, %v3100_v31   ;;  %3254 = vperm.xlu0 %5064, %v3228_v11   ;;  %v3111_v12 = vmul.f32 %v5228_v24, %v6432_v40  ;;  %v2999_v13 = vmul.f32 %v5228_v24, %v6428_v18  ;;  %v3239_v19 = vmul.f32 %v5228_v24, %v6438_v61 }
 0x622   : > { %v5232_v3 = vpop.eup %5231  ;;  %5237 = vrcp.f32 %v2969_v25  ;;  %4946 = vmatprep.subr.bf16.mxu0 %v4945_v63  ;;  %v6914_v25 = vld [vmem:[#allocation54_spill] sm:$0xff] }
 0x623   : > { %v5234_v54 = vpop.eup %5233  ;;  %v2952_v50 = vadd.f32 %v5232_v3, %v5230_v59 }
 0x624   : > { %4948 = vmatpush3.bf16.msra.mxu0 %v4945_v63  ;;  %v6913_v63 = vld [vmem:[#allocation36_spill] sm:$0xff] }
 0x625   : > { %v2968_v41 = vadd.f32 %v5234_v54, %v2952_v50  ;;  %3141 = vperm.xlu1 %5063, %v6453_v49   ;;  %3029 = vperm.xlu0 %5064, %v6459_v21   ;;  %v3600_v21 = vld [vmem:[%s6760_s7] sm:$0xff] }
 0x626   : > { %v5236_v22 = vpop.eup %5235 }
 0x627   : > { %5239 = vrcp.f32 %v2968_v41  ;;  %v2998_v31 = vmul.f32 %v5236_v22, %v6455_v36  ;;  %v3110_v40 = vmul.f32 %v5236_v22, %v6469_v32  ;;  %v3238_v18 = vmul.f32 %v5236_v22, %v5218_v27  ;;  %v6903_v27 = vld [vmem:[#allocation21_spill] sm:$0xff] }
 0x628   : > { %v6916_v41 = vld [vmem:[#allocation25_spill] sm:$0xff] }
 0x629   : > { %3269 = vperm.xlu1 %5063, %v6463_v26   ;;  %3024 = vperm.xlu0 %5064, %v6467_v4   ;;  %v3601_v26 = vld [vmem:[%s6760_s7 + $0x8] sm:$0xff] }
 0x62a   : > { %v4949_v4 = vpack.c.bf16 %v3601_v26, %v3600_v21  ;;  %v6920_v26 = vld [vmem:[#allocation59_spill] sm:$0xff] }
 0x62c   : > { %v5238_v61 = vpop.eup %5237  ;;  %4950 = vmatprep.subr.bf16.mxu0 %v4949_v4  ;;  %4957 = vmatprep.subr.bf16.mxu1 %v4949_v4 }
 0x62d   : > { %3136 = vperm.xlu1 %5063, %v6473_v29   ;;  %3264 = vperm.xlu0 %5064, %v6477_v56   ;;  %v3113_v11 = vmul.f32 %v5238_v61, %v5224_v28  ;;  %v3001_v15 = vmul.f32 %v5238_v61, %v5222_v52  ;;  %v3241_v44 = vmul.f32 %v5238_v61, %v5226_v51  ;;  %v6912_v51 = vld [vmem:[#allocation18_spill] sm:$0xff]  ;;  %v6917_v61 = vld [vmem:[#allocation61_spill] sm:$0xff] }
 0x62e   : > { %4959 = vmatpush3.bf16.msra.mxu1 %v4949_v4 }
 0x631   : > { %v5240_v35 = vpop.eup %5239  ;;  %3151 = vperm.xlu1 %5063, %v6481_v10   ;;  %3039 = vperm.xlu0 %5064, %v6487_v9   ;;  %v6904_v9 = vld [vmem:[#allocation19_spill] sm:$0xff] }
 0x632   : > { %v3112_v57 = vmul.f32 %v5240_v35, %v5232_v3  ;;  %v3000_v49 = vmul.f32 %v5240_v35, %v5230_v59  ;;  %v3240_v36 = vmul.f32 %v5240_v35, %v5234_v54  ;;  %v6915_v54 = vld [vmem:[#allocation43_spill] sm:$0xff] }
 0x635   : > { %3279 = vperm.xlu1 %5063, %v6491_v62   ;;  %3034 = vperm.xlu0 %5064, %v6495_v45   ;;  %v6905_v45 = vld [vmem:[#allocation39_spill] sm:$0xff] }
 0x639   : > { %3146 = vperm.xlu1 %5063, %v6499_v37   ;;  %3274 = vperm.xlu0 %5064, %v6503_v0   ;;  %v6906_v0 = vld [vmem:[#allocation37_spill] sm:$0xff] }
 0x63d   : > { %3161 = vperm.xlu1 %5063, %v6507_v39   ;;  %3049 = vperm.xlu0 %5064, %v6511_v20  }
 0x641   : > { %3289 = vperm.xlu1 %5063, %v6515_v2   ;;  %3044 = vperm.xlu0 %5064, %v6525_v38  }
 0x645   : > { %3156 = vperm.xlu1 %5063, %v6529_v43   ;;  %3284 = vperm.xlu0 %5064, %v6533_v42  }
 0x649   : > { %3171 = vperm.xlu1 %5063, %v6536_v7   ;;  %3059 = vperm.xlu0 %5064, %v2997_v8   ;;  %v6909_v7 = vld [vmem:[#allocation38_spill] sm:$0xff] }
 0x64d   : > { %3299 = vperm.xlu1 %5063, %v3237_v34   ;;  %3054 = vperm.xlu0 %5064, %v2996_v14   ;;  %v6911_v14 = vld [vmem:[#allocation56_spill] sm:$0xff] }
 0x651   : > { %3166 = vperm.xlu1 %5063, %v3108_v6   ;;  %3294 = vperm.xlu0 %5064, %v3236_v60  }
 0x655   : > { %3181 = vperm.xlu1 %5063, %v3111_v12   ;;  %3069 = vperm.xlu0 %5064, %v2999_v13  }
 0x659   : > { %3309 = vperm.xlu1 %5063, %v3239_v19   ;;  %3064 = vperm.xlu0 %5064, %v2998_v31  }
 0x65d   : > { %3176 = vperm.xlu1 %5063, %v3110_v40   ;;  %3304 = vperm.xlu0 %5064, %v3238_v18  }
 0x661   : > { %3191 = vperm.xlu1 %5063, %v3113_v11   ;;  %3079 = vperm.xlu0 %5064, %v3001_v15  }
 0x665   : > { %3186 = vperm.xlu1 %5063, %v3112_v57   ;;  %3074 = vperm.xlu0 %5064, %v3000_v49   ;;  %v6918_v57 = vld [vmem:[#allocation23_spill] sm:$0xff] }
 0x669   : > { %3319 = vperm.xlu1 %5063, %v3241_v44   ;;  %3314 = vperm.xlu0 %5064, %v3240_v36   ;;  %v6919_v36 = vld [vmem:[#allocation41_spill] sm:$0xff] }
 0x68c   : > { %v3010_v32 = vpop.permute.xlu1 %3009  ;;  %v3005_v29 = vpop.permute.xlu0 %3004 }
 0x68d   : > { %v3083_v30 = vmul.f32 %v3010_v32, %v6903_v27  ;;  %v3082_v62 = vmul.f32 %v3005_v29, %v6904_v9  ;;  %v6921_v27 = vld [vmem:[#allocation42_spill] sm:$0xff]  ;;  %v6922_v9 = vld [vmem:[#allocation24_spill] sm:$0xff] }
 0x690   : > { %v3122_v56 = vpop.permute.xlu1 %3121  ;;  %v3117_v10 = vpop.permute.xlu0 %3116 }
 0x691   : > { %v3195_v37 = vmul.f32 %v3122_v56, %v6905_v45  ;;  %v3194_v47 = vmul.f32 %v3117_v10, %v6906_v0 }
 0x693   : > { %v3211_v39 = vadd.f32 %v3195_v37, %v3083_v30  ;;  %v3210_v20 = vadd.f32 %v3194_v47, %v3082_v62  ;;  %v6923_v47 = vld [vmem:[#allocation60_spill] sm:$0xff] }
 0x694   : > { %v3250_v2 = vpop.permute.xlu1 %3249  ;;  %v3245_v53 = vpop.permute.xlu0 %3244 }
 0x695   : > { %v3323_v5 = vmul.f32 %v3250_v2, %v6907_v55  ;;  %v3322_v38 = vmul.f32 %v3245_v53, %v6908_v23  ;;  %v6924_v55 = vld [vmem:[#allocation22_spill] sm:$0xff]  ;;  %v6925_v23 = vld [vmem:[#allocation40_spill] sm:$0xff] }
 0x697   : > { %v3339_v48 = vadd.f32 %v3323_v5, %v3211_v39  ;;  %v3338_v43 = vadd.f32 %v3322_v38, %v3210_v20 }
 0x698   : > { %v3132_v17 = vpop.permute.xlu1 %3131  ;;  %v3020_v42 = vpop.permute.xlu0 %3019 }
 0x699   : > { %v3197_v33 = vmul.f32 %v6909_v7, %v3132_v17  ;;  %v3085_v52 = vmul.f32 %v6910_v16, %v3020_v42  ;;  %4821 = vmatprep.mubr.msk.f32.mxu0 %vm634_vm0, %v3338_v43  ;;  %v6927_v16 = vld [vmem:[#allocation47_spill] sm:$0xff] }
 0x69a   : > { %4822 = vmatmul.mubr.msk.f32.vlgmr.msra.gmra.mrb[48].mxu0 %vm634_vm0, %v3339_v48  ;;  %v6926_v48 = vld [vmem:[#allocation58_spill] sm:$0xff] }
 0x69b   : > { %v3213_v1 = vadd.f32 %v3197_v33, %v3085_v52  ;;  %4952 = vmatpush3.bf16.msra.mxu0 %v4949_v4 }
 0x69c   : > { %v3260_v8 = vpop.permute.xlu1 %3259  ;;  %v3015_v34 = vpop.permute.xlu0 %3014 }
 0x69d   : > { %v3325_v28 = vmul.f32 %v6911_v14, %v3260_v8  ;;  %v3084_v46 = vmul.f32 %v6912_v51, %v3015_v34 }
 0x69f   : > { %v3341_v6 = vadd.f32 %v3325_v28, %v3213_v1  ;;  %v6928_v1 = vld [vmem:[#allocation29_spill] sm:$0xff] }
 0x6a0   : > { %v3127_v60 = vpop.permute.xlu1 %3126  ;;  %v3255_v58 = vpop.permute.xlu0 %3254 }
 0x6a1   : > { %v3196_v24 = vmul.f32 %v6913_v63, %v3127_v60  ;;  %v3324_v59 = vmul.f32 %v6914_v25, %v3255_v58  ;;  %v6930_v63 = vld [vmem:[#allocation27_spill] sm:$0xff]  ;;  %v6931_v25 = vld [vmem:[#allocation45_spill] sm:$0xff] }
 0x6a3   : > { %v3212_v12 = vadd.f32 %v3196_v24, %v3084_v46 }
 0x6a4   : > { %v3142_v13 = vpop.permute.xlu1 %3141  ;;  %v3030_v19 = vpop.permute.xlu0 %3029 }
 0x6a5   : > { %v3340_v3 = vadd.f32 %v3324_v59, %v3212_v12  ;;  %v3199_v50 = vmul.f32 %v3142_v13, %v6915_v54  ;;  %v3087_v22 = vmul.f32 %v3030_v19, %v6916_v41  ;;  %v6932_v12 = vld [vmem:[#allocation63_spill] sm:$0xff]  ;;  %v6933_v41 = vld [vmem:[#allocation46_spill] sm:$0xff] }
 0x6a7   : > { %v3215_v31 = vadd.f32 %v3199_v50, %v3087_v22  ;;  %4824 = vmatprep.mubr.msk.f32.mxu0 %vm634_vm0, %v3340_v3 }
 0x6a8   : > { %4825 = vmatmul.mubr.msk.f32.gmra.mrb[50].mxu0 %vm634_vm0, %v3341_v6  ;;  %v3270_v40 = vpop.permute.xlu1 %3269  ;;  %v3025_v18 = vpop.permute.xlu0 %3024  ;;  %v6929_v6 = vld [vmem:[#allocation65_spill] sm:$0xff] }
 0x6a9   : > { %v3327_v11 = vmul.f32 %v3270_v40, %v6917_v61  ;;  %v3086_v49 = vmul.f32 %v3025_v18, %v6918_v57 }
 0x6ab   : > { %v3343_v15 = vadd.f32 %v3327_v11, %v3215_v31  ;;  %v6934_v31 = vld [vmem:[#allocation28_spill] sm:$0xff] }
 0x6ac   : > { %v3137_v44 = vpop.permute.xlu1 %3136  ;;  %v3265_v35 = vpop.permute.xlu0 %3264 }
 0x6ad   : > { %v3198_v21 = vmul.f32 %v3137_v44, %v6919_v36  ;;  %v3326_v4 = vmul.f32 %v3265_v35, %v6920_v26  ;;  %v6936_v36 = vld [vmem:[#allocation26_spill] sm:$0xff]  ;;  %v6937_v26 = vld [vmem:[#allocation44_spill] sm:$0xff] }
 0x6af   : > { %v3214_v32 = vadd.f32 %v3198_v21, %v3086_v49 }
 0x6b0   : > { %v3152_v29 = vpop.permute.xlu1 %3151  ;;  %v3040_v56 = vpop.permute.xlu0 %3039 }
 0x6b1   : > { %v3342_v10 = vadd.f32 %v3326_v4, %v3214_v32  ;;  %v3201_v30 = vmul.f32 %v6921_v27, %v3152_v29  ;;  %v3089_v62 = vmul.f32 %v6922_v9, %v3040_v56  ;;  %v6938_v32 = vld [vmem:[#allocation62_spill] sm:$0xff]  ;;  %v6939_v9 = vld [vmem:[#allocation51_spill] sm:$0xff] }
 0x6b3   : > { %v3217_v45 = vadd.f32 %v3201_v30, %v3089_v62  ;;  %4827 = vmatprep.mubr.msk.f32.mxu0 %vm634_vm0, %v3342_v10 }
 0x6b4   : > { %4828 = vmatmul.mubr.msk.f32.gmra.mrb[52].mxu0 %vm634_vm0, %v3343_v15  ;;  %v3280_v37 = vpop.permute.xlu1 %3279  ;;  %v3035_v0 = vpop.permute.xlu0 %3034  ;;  %v6935_v15 = vld [vmem:[#allocation64_spill] sm:$0xff] }
 0x6b5   : > { %v3329_v39 = vmul.f32 %v6923_v47, %v3280_v37  ;;  %v3088_v5 = vmul.f32 %v6924_v55, %v3035_v0 }
 0x6b7   : > { %v3345_v20 = vadd.f32 %v3329_v39, %v3217_v45  ;;  %v6940_v45 = vld [vmem:[#allocation33_spill] sm:$0xff] }
 0x6b8   : > { %v3147_v2 = vpop.permute.xlu1 %3146  ;;  %v3275_v53 = vpop.permute.xlu0 %3274 }
 0x6b9   : > { %v3200_v38 = vmul.f32 %v6925_v23, %v3147_v2  ;;  %v3328_v43 = vmul.f32 %v6926_v48, %v3275_v53  ;;  %v6942_v23 = vld [vmem:[#allocation31_spill] sm:$0xff]  ;;  %v6943_v48 = vld [vmem:[#allocation49_spill] sm:$0xff] }
 0x6bb   : > { %v3216_v17 = vadd.f32 %v3200_v38, %v3088_v5 }
 0x6bc   : > { %v3162_v42 = vpop.permute.xlu1 %3161  ;;  %v3050_v7 = vpop.permute.xlu0 %3049 }
 0x6bd   : > { %v3344_v33 = vadd.f32 %v3328_v43, %v3216_v17  ;;  %v3203_v52 = vmul.f32 %v3162_v42, %v6927_v16  ;;  %v3091_v8 = vmul.f32 %v3050_v7, %v6928_v1  ;;  %v6944_v17 = vld [vmem:[#allocation67_spill] sm:$0xff]  ;;  %v6945_v1 = vld [vmem:[#allocation50_spill] sm:$0xff] }
 0x6bf   : > { %v3219_v34 = vadd.f32 %v3203_v52, %v3091_v8  ;;  %4830 = vmatprep.mubr.msk.f32.mxu0 %vm634_vm0, %v3344_v33 }
 0x6c0   : > { %4831 = vmatmul.mubr.msk.f32.gmra.mrb[54].mxu0 %vm634_vm0, %v3345_v20  ;;  %v3290_v14 = vpop.permute.xlu1 %3289  ;;  %v3045_v28 = vpop.permute.xlu0 %3044  ;;  %v6941_v20 = vld [vmem:[#allocation69_spill] sm:$0xff] }
 0x6c1   : > { %v3331_v60 = vmul.f32 %v3290_v14, %v6929_v6  ;;  %v3090_v24 = vmul.f32 %v3045_v28, %v6930_v63 }
 0x6c3   : > { %v3347_v58 = vadd.f32 %v3331_v60, %v3219_v34  ;;  %v6946_v34 = vld [vmem:[#allocation32_spill] sm:$0xff] }
 0x6c4   : > { %v3157_v51 = vpop.permute.xlu1 %3156  ;;  %v3285_v46 = vpop.permute.xlu0 %3284 }
 0x6c5   : > { %v3202_v59 = vmul.f32 %v3157_v51, %v6931_v25  ;;  %v3330_v13 = vmul.f32 %v3285_v46, %v6932_v12  ;;  %v6948_v46 = vld [vmem:[#allocation30_spill] sm:$0xff]  ;;  %v6949_v12 = vld [vmem:[#allocation68_spill] sm:$0xff] }
 0x6c7   : > { %v3218_v19 = vadd.f32 %v3202_v59, %v3090_v24 }
 0x6c8   : > { %v3172_v3 = vpop.permute.xlu1 %3171  ;;  %v3060_v54 = vpop.permute.xlu0 %3059 }
 0x6c9   : > { %v3346_v50 = vadd.f32 %v3330_v13, %v3218_v19  ;;  %v3205_v22 = vmul.f32 %v6933_v41, %v3172_v3  ;;  %v3093_v40 = vmul.f32 %v6934_v31, %v3060_v54  ;;  %v6950_v19 = vld [vmem:[#allocation66_spill] sm:$0xff]  ;;  %v3602_v41 = vld [vmem:[%s6760_s7 + $0x10] sm:$0xff] }
 0x6cb   : > { %v3221_v18 = vadd.f32 %v3205_v22, %v3093_v40  ;;  %4833 = vmatprep.mubr.msk.f32.mxu0 %vm634_vm0, %v3346_v50  ;;  %v3603_v22 = vld [vmem:[%s6760_s7 + $0x18] sm:$0xff]  ;;  %v6649_v40 = vstv %s3924_s28 }
 0x6cc   : > { %4834 = vmatmul.mubr.msk.f32.gmra.mrb[56].mxu0 %vm634_vm0, %v3347_v58  ;;  %v3300_v61 = vpop.permute.xlu1 %3299  ;;  %v3055_v11 = vpop.permute.xlu0 %3054  ;;  %v6947_v58 = vld [vmem:[#allocation48_spill] sm:$0xff]  ;;  %v4953_v31 = vpack.c.bf16 %v3603_v22, %v3602_v41 }
 0x6cd   : > { %v3333_v44 = vmul.f32 %v6935_v15, %v3300_v61  ;;  %v3092_v21 = vmul.f32 %v6936_v36, %v3055_v11 }
 0x6ce   : > { %4954 = vmatprep.subr.bf16.mxu0 %v4953_v31  ;;  %4958 = vmatprep.subr.bf16.mxu1 %v4953_v31 }
 0x6cf   : > { %v3349_v35 = vadd.f32 %v3333_v44, %v3221_v18  ;;  %4956 = vmatpush3.bf16.msra.mxu0 %v4953_v31  ;;  %4960 = vmatpush3.bf16.msra.mxu1 %v4953_v31 }
 0x6d0   : > { %v3167_v57 = vpop.permute.xlu1 %3166  ;;  %v3295_v49 = vpop.permute.xlu0 %3294 }
 0x6d1   : > { %v3204_v4 = vmul.f32 %v6937_v26, %v3167_v57  ;;  %v3332_v29 = vmul.f32 %v6938_v32, %v3295_v49 }
 0x6d3   : > { %v3220_v56 = vadd.f32 %v3204_v4, %v3092_v21 }
 0x6d4   : > { %v3182_v10 = vpop.permute.xlu1 %3181  ;;  %v3070_v27 = vpop.permute.xlu0 %3069 }
 0x6d5   : > { %v3348_v30 = vadd.f32 %v3332_v29, %v3220_v56  ;;  %v3207_v62 = vmul.f32 %v3182_v10, %v6939_v9  ;;  %v3095_v37 = vmul.f32 %v3070_v27, %v6940_v45 }
 0x6d7   : > { %v3223_v0 = vadd.f32 %v3207_v62, %v3095_v37  ;;  %4836 = vmatprep.mubr.msk.f32.mxu0 %vm634_vm0, %v3348_v30 }
 0x6d8   : > { %4837 = vmatmul.mubr.msk.f32.gmra.mrb[58].mxu0 %vm634_vm0, %v3349_v35  ;;  %v3310_v47 = vpop.permute.xlu1 %3309  ;;  %v3065_v39 = vpop.permute.xlu0 %3064 }
 0x6d9   : > { %v3335_v2 = vmul.f32 %v3310_v47, %v6941_v20  ;;  %v3094_v38 = vmul.f32 %v3065_v39, %v6942_v23 }
 0x6db   : > { %v3351_v53 = vadd.f32 %v3335_v2, %v3223_v0 }
 0x6dc   : > { %v3177_v55 = vpop.permute.xlu1 %3176  ;;  %v3305_v5 = vpop.permute.xlu0 %3304 }
 0x6dd   : > { %v3206_v43 = vmul.f32 %v3177_v55, %v6943_v48  ;;  %v3334_v42 = vmul.f32 %v3305_v5, %v6944_v17 }
 0x6df   : > { %v3222_v7 = vadd.f32 %v3206_v43, %v3094_v38 }
 0x6e0   : > { %v3192_v33 = vpop.permute.xlu1 %3191  ;;  %v3080_v16 = vpop.permute.xlu0 %3079 }
 0x6e1   : > { %v3350_v52 = vadd.f32 %v3334_v42, %v3222_v7  ;;  %v3209_v8 = vmul.f32 %v6945_v1, %v3192_v33  ;;  %v3097_v14 = vmul.f32 %v6946_v34, %v3080_v16 }
 0x6e3   : > { %v3225_v28 = vadd.f32 %v3209_v8, %v3097_v14  ;;  %4839 = vmatprep.mubr.msk.f32.mxu0 %vm634_vm0, %v3350_v52 }
 0x6e4   : > { %4840 = vmatmul.mubr.msk.f32.gmra.mrb[60].mxu0 %vm634_vm0, %v3351_v53  ;;  %v3187_v6 = vpop.permute.xlu1 %3186  ;;  %v3075_v60 = vpop.permute.xlu0 %3074 }
 0x6e5   : > { %v3208_v51 = vmul.f32 %v6947_v58, %v3187_v6  ;;  %v3096_v63 = vmul.f32 %v6948_v46, %v3075_v60 }
 0x6e7   : > { %v3224_v24 = vadd.f32 %v3208_v51, %v3096_v63 }
 0x6e8   : > { %v3320_v25 = vpop.permute.xlu1 %3319  ;;  %v3315_v59 = vpop.permute.xlu0 %3314 }
 0x6e9   : > { %v3337_v13 = vmul.f32 %v6949_v12, %v3320_v25  ;;  %v3336_v3 = vmul.f32 %v6950_v19, %v3315_v59 }
 0x6eb   : > { %v3353_v54 = vadd.f32 %v3337_v13, %v3225_v28  ;;  %v3352_v50 = vadd.f32 %v3336_v3, %v3224_v24 }
 0x6ed   : > { %4842 = vmatprep.mubr.msk.f32.mxu0 %vm634_vm0, %v3352_v50 }
 0x6ee   : > { %4843 = vmatmul.mubr.msk.f32.gmra.mrb[62].mxu0 %vm634_vm0, %v3353_v54 }
 0x76d   : > { %v4823_v18 = vpop.f32.mrb[48].mxu0 }
 0x76e   : > { %v3569_v61 = vmul.f32 %v4823_v18, %v6649_v40  ;;  %v3472_v11 = vpop.f32.mrb[49].mxu0  ;;  %vm3552_vm3 = vcmp.ge.f32.partialorder %v4823_v18, 0.0 }
 0x76f   : > { %vm3551_vm4 = vcmp.ge.f32.partialorder %v3472_v11, 0.0  ;;  %v3568_v15 = vmul.f32 %v6649_v40, %v3472_v11 }
 0x770   : > { %v3585_v35 = vsel %vm3552_vm3, %v4823_v18, %v3569_v61 }
 0x771   : > { %v3584_v44 = vsel %vm3551_vm4, %v3472_v11, %v3568_v15 }
 0x772   : > { %4853 = vmatprep.mubr.msk.f32.mxu0 %vm634_vm0, %v3584_v44 }
 0x773   : > { %4854 = vmatmul.mubr.msk.f32.vlgmr.msra.gmra.mrb[64].mxu0 %vm634_vm0, %v3585_v35 }
 0x77b   : > { %v4826_v57 = vpop.f32.mrb[50].mxu0 }
 0x77c   : > { %v3571_v49 = vmul.f32 %v4826_v57, %v6649_v40  ;;  %v3482_v36 = vpop.f32.mrb[51].mxu0  ;;  %vm3554_vm5 = vcmp.ge.f32.partialorder %v4826_v57, 0.0 }
 0x77d   : > { %vm3553_vm6 = vcmp.ge.f32.partialorder %v3482_v36, 0.0  ;;  %v3570_v21 = vmul.f32 %v6649_v40, %v3482_v36 }
 0x77e   : > { %v3587_v4 = vsel %vm3554_vm5, %v4826_v57, %v3571_v49 }
 0x77f   : > { %v3586_v26 = vsel %vm3553_vm6, %v3482_v36, %v3570_v21 }
 0x780   : > { %4856 = vmatprep.mubr.msk.f32.mxu1 %vm634_vm0, %v3586_v26 }
 0x781   : > { %4857 = vmatmul.mubr.msk.f32.vlgmr.msra.gmra.mrb[96].mxu1 %vm634_vm0, %v3587_v4 }
 0x787   : > { %v4829_v32 = vpop.f32.mrb[52].mxu0 }
 0x788   : > { %v3573_v29 = vmul.f32 %v4829_v32, %v6649_v40  ;;  %v3492_v56 = vpop.f32.mrb[53].mxu0  ;;  %vm3556_vm7 = vcmp.ge.f32.partialorder %v4829_v32, 0.0 }
 0x789   : > { %vm3555_vm8 = vcmp.ge.f32.partialorder %v3492_v56, 0.0  ;;  %v3572_v10 = vmul.f32 %v6649_v40, %v3492_v56 }
 0x78a   : > { %v3589_v30 = vsel %vm3556_vm7, %v4829_v32, %v3573_v29 }
 0x78b   : > { %v3588_v27 = vsel %vm3555_vm8, %v3492_v56, %v3572_v10 }
 0x78c   : > { %4859 = vmatprep.mubr.msk.f32.mxu1 %vm634_vm0, %v3588_v27 }
 0x78d   : > { %4860 = vmatmul.mubr.msk.f32.gmra.mrb[98].mxu1 %vm634_vm0, %v3589_v30 }
 0x793   : > { %v4832_v9 = vpop.f32.mrb[54].mxu0 }
 0x794   : > { %v3575_v62 = vmul.f32 %v4832_v9, %v6649_v40  ;;  %v3502_v45 = vpop.f32.mrb[55].mxu0  ;;  %vm3558_vm9 = vcmp.ge.f32.partialorder %v4832_v9, 0.0 }
 0x795   : > { %vm3557_vm10 = vcmp.ge.f32.partialorder %v3502_v45, 0.0  ;;  %v3574_v37 = vmul.f32 %v6649_v40, %v3502_v45 }
 0x796   : > { %v3591_v47 = vsel %vm3558_vm9, %v4832_v9, %v3575_v62 }
 0x797   : > { %v3590_v0 = vsel %vm3557_vm10, %v3502_v45, %v3574_v37 }
 0x798   : > { %4862 = vmatprep.mubr.msk.f32.mxu1 %vm634_vm0, %v3590_v0 }
 0x799   : > { %4863 = vmatmul.mubr.msk.f32.gmra.mrb[100].mxu1 %vm634_vm0, %v3591_v47 }
 0x79f   : > { %v4835_v39 = vpop.f32.mrb[56].mxu0 }
 0x7a0   : > { %v3577_v20 = vmul.f32 %v4835_v39, %v6649_v40  ;;  %v3512_v2 = vpop.f32.mrb[57].mxu0  ;;  %vm3560_vm11 = vcmp.ge.f32.partialorder %v4835_v39, 0.0 }
 0x7a1   : > { %vm3559_vm12 = vcmp.ge.f32.partialorder %v3512_v2, 0.0  ;;  %v3576_v53 = vmul.f32 %v6649_v40, %v3512_v2 }
 0x7a2   : > { %v3593_v5 = vsel %vm3560_vm11, %v4835_v39, %v3577_v20 }
 0x7a3   : > { %v3592_v55 = vsel %vm3559_vm12, %v3512_v2, %v3576_v53 }
 0x7a4   : > { %4865 = vmatprep.mubr.msk.f32.mxu1 %vm634_vm0, %v3592_v55 }
 0x7a5   : > { %4866 = vmatmul.mubr.msk.f32.gmra.mrb[102].mxu1 %vm634_vm0, %v3593_v5 }
 0x7ab   : > { %v4838_v23 = vpop.f32.mrb[58].mxu0 }
 0x7ac   : > { %v3579_v38 = vmul.f32 %v4838_v23, %v6649_v40  ;;  %v3522_v48 = vpop.f32.mrb[59].mxu0  ;;  %vm3562_vm13 = vcmp.ge.f32.partialorder %v4838_v23, 0.0 }
 0x7ad   : > { %vm3561_vm14 = vcmp.ge.f32.partialorder %v3522_v48, 0.0  ;;  %v3578_v43 = vmul.f32 %v6649_v40, %v3522_v48 }
 0x7ae   : > { %v3595_v42 = vsel %vm3562_vm13, %v4838_v23, %v3579_v38 }
 0x7af   : > { %v3594_v17 = vsel %vm3561_vm14, %v3522_v48, %v3578_v43 }
 0x7b0   : > { %4868 = vmatprep.mubr.msk.f32.mxu1 %vm634_vm0, %v3594_v17 }
 0x7b1   : > { %4869 = vmatmul.mubr.msk.f32.gmra.mrb[104].mxu1 %vm634_vm0, %v3595_v42 }
 0x7b7   : > { %v4841_v7 = vpop.f32.mrb[60].mxu0 }
 0x7b8   : > { %v3581_v33 = vmul.f32 %v4841_v7, %v6649_v40  ;;  %v3532_v16 = vpop.f32.mrb[61].mxu0  ;;  %vm3564_vm15 = vcmp.ge.f32.partialorder %v4841_v7, 0.0 }
 0x7b9   : > { %vm3563_vm1 = vcmp.ge.f32.partialorder %v3532_v16, 0.0  ;;  %v3580_v52 = vmul.f32 %v6649_v40, %v3532_v16 }
 0x7ba   : > { %v3597_v8 = vsel %vm3564_vm15, %v4841_v7, %v3581_v33 }
 0x7bb   : > { %v3596_v1 = vsel %vm3563_vm1, %v3532_v16, %v3580_v52 }
 0x7bc   : > { %4871 = vmatprep.mubr.msk.f32.mxu1 %vm634_vm0, %v3596_v1 }
 0x7bd   : > { %4872 = vmatmul.mubr.msk.f32.gmra.mrb[106].mxu1 %vm634_vm0, %v3597_v8 }
 0x7c1   : > { %v4844_v34 = vpop.f32.mrb[62].mxu0 }
 0x7c2   : > { %v3583_v14 = vmul.f32 %v4844_v34, %v6649_v40  ;;  %v3542_v28 = vpop.f32.mrb[63].mxu0  ;;  %vm3566_vm2 = vcmp.ge.f32.partialorder %v4844_v34, 0.0 }
 0x7c3   : > { %vm3565_vm3 = vcmp.ge.f32.partialorder %v3542_v28, 0.0  ;;  %v3582_v6 = vmul.f32 %v6649_v40, %v3542_v28 }
 0x7c4   : > { %v3599_v58 = vsel %vm3566_vm2, %v4844_v34, %v3583_v14 }
 0x7c5   : > { %v3598_v60 = vsel %vm3565_vm3, %v3542_v28, %v3582_v6 }
 0x7c6   : > { %4874 = vmatprep.mubr.msk.f32.mxu1 %vm634_vm0, %v3598_v60 }
 0x7c7   : > { %4875 = vmatmul.mubr.msk.f32.gmra.mrb[108].mxu1 %vm634_vm0, %v3599_v58 }
 0x846   : > { %v4855_v51 = vpop.f32.mrb[64].mxu0 }
 0x847   : > { %3798 = vst [vmem:[%s6684_s16 + $0x8] sm:$0xff] %v4855_v51  ;;  %v3718_v46 = vpop.f32.mrb[65].mxu0 }
 0x848   : > { %3797 = vst [vmem:[%s6684_s16] sm:$0xff] %v3718_v46 }
 0x854   : > { %v4858_v63 = vpop.f32.mrb[96].mxu1 }
 0x855   : > { %3800 = vst [vmem:[%s6684_s16 + $0x18] sm:$0xff] %v4858_v63  ;;  %v3728_v24 = vpop.f32.mrb[97].mxu1 }
 0x856   : > { %3799 = vst [vmem:[%s6684_s16 + $0x10] sm:$0xff] %v3728_v24 }
 0x860   : > { %v4861_v25 = vpop.f32.mrb[98].mxu1 }
 0x861   : > { %3802 = vst [vmem:[%s6684_s16 + $0x28] sm:$0xff] %v4861_v25  ;;  %v3738_v59 = vpop.f32.mrb[99].mxu1 }
 0x862   : > { %3801 = vst [vmem:[%s6684_s16 + $0x20] sm:$0xff] %v3738_v59 }
 0x86c   : > { %v4864_v12 = vpop.f32.mrb[100].mxu1 }
 0x86d   : > { %3804 = vst [vmem:[%s6684_s16 + $0x38] sm:$0xff] %v4864_v12  ;;  %v3748_v13 = vpop.f32.mrb[101].mxu1 }
 0x86e   : > { %3803 = vst [vmem:[%s6684_s16 + $0x30] sm:$0xff] %v3748_v13 }
 0x878   : > { %v4867_v19 = vpop.f32.mrb[102].mxu1 }
 0x879   : > { %3806 = vst [vmem:[%s6684_s16 + $0x48] sm:$0xff] %v4867_v19  ;;  %v3758_v3 = vpop.f32.mrb[103].mxu1 }
 0x87a   : > { %3805 = vst [vmem:[%s6684_s16 + $0x40] sm:$0xff] %v3758_v3 }
 0x884   : > { %v4870_v54 = vpop.f32.mrb[104].mxu1 }
 0x885   : > { %3808 = vst [vmem:[%s6684_s16 + $0x58] sm:$0xff] %v4870_v54  ;;  %v3768_v50 = vpop.f32.mrb[105].mxu1 }
 0x886   : > { %3807 = vst [vmem:[%s6684_s16 + $0x50] sm:$0xff] %v3768_v50 }
 0x890   : > { %v4873_v41 = vpop.f32.mrb[106].mxu1 }
 0x891   : > { %3810 = vst [vmem:[%s6684_s16 + $0x68] sm:$0xff] %v4873_v41  ;;  %v3778_v22 = vpop.f32.mrb[107].mxu1 }
 0x892   : > { %3809 = vst [vmem:[%s6684_s16 + $0x60] sm:$0xff] %v3778_v22 }
 0x89a   : > { %v4876_v31 = vpop.f32.mrb[108].mxu1 }
 0x89b   : > { %3812 = vst [vmem:[%s6684_s16 + $0x78] sm:$0xff] %v4876_v31  ;;  %v3788_v40 = vpop.f32.mrb[109].mxu1 }
 0x89c   : > { %3811 = vst [vmem:[%s6684_s16 + $0x70] sm:$0xff] %v3788_v40 }
 0x89d   : > { %5269 = shalt.err (!%p5266_p3)
}
 0x89e   : > { %s5270_s29 = scalar_lea.hbm %s6705_s12, 2048  ;;  %s5274_s27 = scalar_lea.hbm %s6762_s9, 4096 }
 0x89f   : > { %p5271_p7 = scmp.ne.s32.totalorder %s6705_s12, %s5270_s29  ;;  %p5275_p10 = scmp.lt.u32.totalorder %s6705_s12, %s6762_s9 }
 0x8a0   : > { %p5276_p11 = scmp.lt.u32.totalorder %s5274_s27, %s5270_s29  ;;  %p5278_p12 = scmp.lt.u32.totalorder %s5270_s29, %s6705_s12 }
 0x8a1   : > { %p5272_p8 = pnand %p5271_p7, %p6951_p5 }
 0x8a2   : > { %p5277_p4 = por %p5276_p11, %p5275_p10 }
 0x8a3   : > { %p5273_p9 = pneg %p5272_p8 }
 0x8a4   : > { %p5279_p13 = por %p5278_p12, %p5277_p4 }
 0x8a6   : > { %p5280_p1 = pnand %p5279_p13, %p5273_p9 }
 0x8a8   : > { %5283 = shalt.err (!%p5280_p1)
}
 0x8a9   : > { %s5337_s16 = smov 128   ;;  %s5338_s24 = smov 8  }
 0x8aa   : > { %5008 = dma.vmem_to_hbm [thread:$0]  (%p6951_p5), %s6707_s14, 2048, %s6705_s12, %s3814_s18, %s5337_s16, %s5337_s16, %s5338_s24  }
 0x8ab PF: > { %s3842_s11 = sand.u32 1, %s5314_s30   ;;  %p6953_p0 = scmp.ne.s32.totalorder %s6829_s22, 0 }
 0x8ac   : > { %s3843_s15 = scalar_lea.sflag [#allocation4], %s3842_s11 }
 0x8ad   : > { %p5015_p2 = pnand %p3915_p6, %p6953_p0 }
 0x8af   : > { %5309 = dma.done.wait (!%p5015_p2), %s3843_s15, 2048  }
 0x8b0   : > { %5311 = vsyncadd (!%p5015_p2), %s3843_s15, 4294965248  ;;  %s6954_s12 = sld [smem:[#allocation16_spill]]  ;;  %s6955_s13 = sld [smem:[#allocation14_spill]] }
 0x8b1   : > { %s6956_s11 = sld [smem:[#allocation17_spill]]  ;;  %s6957_s30 = smov %s5318_s10 }
 0x8b6   : > { %p23_p3 = scmp.ge.s32.totalorder %s6954_s12, 4   ;;  %s6958_s10 = smov %s6955_s13 }
 0x8b8   :  { %25 = sbr.rel (!%p23_p3) target bundleno = 8 (0x8), region = 117 }
 0x8bf   :  { %3848 = vsyncpa [#allocation3], 1 }
 0x8c0   :  { %3850 = vsyncpa [#allocation3 + $0x1], 1 }
 0x8c1   :  { %3851 = vsyncpa [#allocation4], 1 }
 0x8c2   :  { %3853 = vsyncpa [#allocation4 + $0x1], 1 }
 0x8c3   :  { %3854 = vsyncpa [#allocation5], 1 }
 0x8c4   :  { %3856 = vsyncpa [#allocation5 + $0x1], 1 }

</bundles_post_ra>
